<compile_context>
chip_gen: v7x
topology: tpu7x:2x2x1
jax: 0.10.0
libtpu: 0.0.40
codegen_flags: <defaults>
</compile_context>

<pallas_src>
import jax
import jax.numpy as jnp
from jax import lax
from jax.experimental import pallas as pl
from jax.experimental.pallas import tpu as pltpu


def gvgru1_kernel(x_ref, wa_ref, ba_ref, wgh_ref, wgx_ref, bg_ref,
                  wo_ref, bo_ref, out_ref):
    # x_ref:   (T, 1, BB)  time-reversed input, batch on lanes
    # wa_ref:  (H, H)  gate_after.weight        ba_ref:  (H, 1)
    # wgh_ref: (H, H)  gate.weight[:, :H]       wgx_ref: (H, 1)  gate.weight[:, H:]
    # bg_ref:  (H, 1)
    # wo_ref:  (1, H)  output.weight            bo_ref:  (1, 1)
    # out_ref: (1, BB)
    T = x_ref.shape[0]
    BB = x_ref.shape[2]
    H = wa_ref.shape[0]

    # Hoist loop-invariant loads/broadcasts out of the recurrence.  The matmul
    # weights are cast to bf16 ONCE so every per-step dot is a single MXU pass
    # (f32 accumulate); all state math stays f32.
    wa = wa_ref[...].astype(jnp.bfloat16)        # (H, H)
    wgh = wgh_ref[...].astype(jnp.bfloat16)      # (H, H)
    ba = jnp.broadcast_to(ba_ref[...], (H, BB))  # lane-broadcast, hoisted
    wgx = jnp.broadcast_to(wgx_ref[...], (H, BB))
    bg = jnp.broadcast_to(bg_ref[...], (H, BB))

    def step(t, h):
        # reset_gate and update_gate are the SAME linear (gate_after) of hidden
        g = jnp.dot(wa, h.astype(jnp.bfloat16),
                    preferred_element_type=jnp.float32) + ba
        u = 0.5 * jnp.tanh(0.5 * g) + 0.5              # == sigmoid, single EUP op
        # Input term: VPU filler off the serial h->h critical path.
        xw = wgx * x_ref[t] + bg                       # (H,1)*(1,BB)+(H,BB)
        pre = jnp.dot(wgh, (u * h).astype(jnp.bfloat16),
                      preferred_element_type=jnp.float32) + xw
        hh = jnp.maximum(pre, 0.0)                     # ReLU
        return h + u * (hh - h)                        # == u*hh + (1-u)*h

    h0 = jnp.zeros((H, BB), jnp.float32)
    # Small static T: fully unroll so the LLO scheduler sees across iterations.
    # Long T: partial unroll to keep the instruction footprint / regalloc sane.
    h = lax.fori_loop(0, T, step, h0, unroll=True if T <= 64 else 8)

    # Epilogue projection: (1,H)@(H,BB) -> lane-dense (1, BB) store.
    out_ref[...] = (jnp.dot(wo_ref[...].astype(jnp.bfloat16),
                            h.astype(jnp.bfloat16),
                            preferred_element_type=jnp.float32)
                    + bo_ref[...])


def gvgru1_forward(x, params):
    B, T = x.shape
    H = params["gate_after_w"].shape[0]
    # The module's cat((r*h, x_slice), 1) into `gate` implies input_size == 1;
    # guard against a mismatched checkpoint silently mis-splitting the weight.
    assert params["gate_w"].shape == (H, H + 1), "kernel assumes input_size == 1"

    # Batch lives on lanes.  Tiny batches: one full-extent block (padded to a
    # sublane multiple).  Large batches: 128-wide lane-full blocks -> >=2 grid
    # steps, so on v7x both TensorCores get work via "parallel" semantics.
    if B <= 128:
        BB = Bp = max(8, ((B + 7) // 8) * 8)
    else:
        BB = 128
        Bp = ((B + 127) // 128) * 128

    # time-major, time-reversed, batch on the last (lane) dim: (T, 1, Bp)
    x_rev = x[:, ::-1].astype(jnp.float32).T.reshape(T, 1, B)
    if Bp != B:
        x_rev = jnp.pad(x_rev, ((0, 0), (0, 0), (0, Bp - B)))

    # Weights are passed UN-transposed: with h carried as (H, B) the per-step
    # products are W @ h, i.e. exactly the PyTorch weight matrices.
    wa = params["gate_after_w"].astype(jnp.float32)              # (H, H)
    ba = params["gate_after_b"].reshape(H, 1).astype(jnp.float32)
    wg = params["gate_w"].astype(jnp.float32)                    # (H, H+1)
    wgh = wg[:, :H]                                              # (H, H)
    wgx = wg[:, H:]                                              # (H, 1)
    bg = params["gate_b"].reshape(H, 1).astype(jnp.float32)
    wo = params["output_w"].astype(jnp.float32)                  # (1, H)
    bo = params["output_b"].reshape(1, 1).astype(jnp.float32)

    # TODO(synk): if T ever grows so the double-buffered x block (2*T*BB*4 B)
    # nears the scoped-VMEM limit (~32 MiB; v7x physical 64 MiB), stream x over
    # an inner "arbitrary" T-chunk grid axis with h carried in VMEM scratch.
    out = pl.pallas_call(
        gvgru1_kernel,
        out_shape=jax.ShapeDtypeStruct((1, Bp), jnp.float32),
        grid=(Bp // BB,),
        in_specs=[
            pl.BlockSpec((T, 1, BB), lambda i: (0, 0, i)),
            pl.BlockSpec((H, H), lambda i: (0, 0)),
            pl.BlockSpec((H, 1), lambda i: (0, 0)),
            pl.BlockSpec((H, H), lambda i: (0, 0)),
            pl.BlockSpec((H, 1), lambda i: (0, 0)),
            pl.BlockSpec((H, 1), lambda i: (0, 0)),
            pl.BlockSpec((1, H), lambda i: (0, 0)),
            pl.BlockSpec((1, 1), lambda i: (0, 0)),
        ],
        out_specs=pl.BlockSpec((1, BB), lambda i: (0, i)),
        compiler_params=pltpu.CompilerParams(
            dimension_semantics=("parallel",)),
    )(x_rev, wa, ba, wgh, wgx, bg, wo, bo)

    # back to the module's (B, input_size=1) layout
    return out[0, :B].reshape(B, 1)


def init_params(key, input_size, hidden_size):
    """Deterministic init mirroring nn.Linear defaults (U(-1/sqrt(fan_in), ...))."""
    ks = jax.random.split(key, 6)

    def linear(kw, kb, fan_in, fan_out):
        bound = 1.0 / float(jnp.sqrt(jnp.float32(fan_in)))
        w = jax.random.uniform(kw, (fan_out, fan_in), jnp.float32, -bound, bound)
        b = jax.random.uniform(kb, (fan_out,), jnp.float32, -bound, bound)
        return w, b

    gate_w, gate_b = linear(ks[0], ks[1], input_size + hidden_size, hidden_size)
    ga_w, ga_b = linear(ks[2], ks[3], hidden_size, hidden_size)
    out_w, out_b = linear(ks[4], ks[5], hidden_size, input_size)
    return dict(gate_w=gate_w, gate_b=gate_b,
                gate_after_w=ga_w, gate_after_b=ga_b,
                output_w=out_w, output_b=out_b)


def gvgru1_ref(x, params):
    """Pure-JAX reference transcribing the PyTorch forward literally."""
    B, T = x.shape
    H = params["gate_after_w"].shape[0]
    h = jnp.zeros((B, H), jnp.float32)
    for time in range(T):
        xs = x[:, T - 1 - time].reshape(B, 1).astype(jnp.float32)
        g = h @ params["gate_after_w"].T + params["gate_after_b"]
        r = jax.nn.sigmoid(g)
        u = r
        comb2 = jnp.concatenate([r * h, xs], axis=1)
        hh = jnp.maximum(comb2 @ params["gate_w"].T + params["gate_b"], 0.0)
        h = u * hh + (1.0 - u) * h
    return h @ params["output_w"].T + params["output_b"]


if __name__ == "__main__":
    input_size = 1      # implied by the forward's cat((r*h, x_slice)) into `gate`
    hidden_size = 32
    batch = 4
    seq = 8

    key = jax.random.PRNGKey(0)
    k_param, k_x = jax.random.split(key)
    params = init_params(k_param, input_size, hidden_size)
    x = jax.random.normal(k_x, (batch, seq), jnp.float32)

    out = gvgru1_forward(x, params)
    out = jax.block_until_ready(out)

    ref = gvgru1_ref(x, params)
    assert out.shape == (batch, input_size)
    # Kernel matmuls run as single bf16 MXU passes (f32 accumulate); the ref is
    # f32-accurate, so tolerance is bf16-level over the 8-step recurrence.
    assert jnp.allclose(out, ref, atol=3e-2, rtol=3e-2), (out, ref)

    print("KERNEL_OK")
</pallas_src>

<mosaic_0001>
module attributes {stable_mosaic.version = 11 : i64} {
  func.func @gvgru1_kernel(%arg0: i32, %arg1: memref<8x1x8xf32, #tpu.memory_space<vmem>>, %arg2: memref<32x32xf32, #tpu.memory_space<vmem>>, %arg3: memref<32x1xf32, #tpu.memory_space<vmem>>, %arg4: memref<32x32xf32, #tpu.memory_space<vmem>>, %arg5: memref<32x1xf32, #tpu.memory_space<vmem>>, %arg6: memref<32x1xf32, #tpu.memory_space<vmem>>, %arg7: memref<1x32xf32, #tpu.memory_space<vmem>>, %arg8: memref<1x1xf32, #tpu.memory_space<vmem>>, %arg9: memref<1x8xf32, #tpu.memory_space<vmem>>) attributes {dimension_semantics = [#tpu.dimension_semantics<parallel>], iteration_bounds = array<i64: 1>, scalar_prefetch = 0 : i64, scratch_operands = 0 : i64, tpu.core_type = #tpu.core_type<tc>, window_params = [{transform_indices = @transform_0, window_bounds = array<i64: 8, 1, 8>}, {pipeline_mode = #tpu.pipeline_mode<synchronous>, transform_indices = @transform_1, window_bounds = array<i64: 32, 32>}, {pipeline_mode = #tpu.pipeline_mode<synchronous>, transform_indices = @transform_2, window_bounds = array<i64: 32, 1>}, {pipeline_mode = #tpu.pipeline_mode<synchronous>, transform_indices = @transform_3, window_bounds = array<i64: 32, 32>}, {pipeline_mode = #tpu.pipeline_mode<synchronous>, transform_indices = @transform_4, window_bounds = array<i64: 32, 1>}, {pipeline_mode = #tpu.pipeline_mode<synchronous>, transform_indices = @transform_5, window_bounds = array<i64: 32, 1>}, {pipeline_mode = #tpu.pipeline_mode<synchronous>, transform_indices = @transform_6, window_bounds = array<i64: 1, 32>}, {pipeline_mode = #tpu.pipeline_mode<synchronous>, transform_indices = @transform_7, window_bounds = array<i64: 1, 1>}, {transform_indices = @transform_8, window_bounds = array<i64: 1, 8>}]} {
    %c0 = arith.constant 0 : index
    %c0_0 = arith.constant 0 : index
    %0 = vector.load %arg2[%c0, %c0_0] : memref<32x32xf32, #tpu.memory_space<vmem>>, vector<32x32xf32>
    %1 = arith.truncf %0 : vector<32x32xf32> to vector<32x32xbf16>
    %c0_1 = arith.constant 0 : index
    %c0_2 = arith.constant 0 : index
    %2 = vector.load %arg4[%c0_1, %c0_2] : memref<32x32xf32, #tpu.memory_space<vmem>>, vector<32x32xf32>
    %3 = arith.truncf %2 : vector<32x32xf32> to vector<32x32xbf16>
    %c0_3 = arith.constant 0 : index
    %c0_4 = arith.constant 0 : index
    %4 = vector.load %arg3[%c0_3, %c0_4] : memref<32x1xf32, #tpu.memory_space<vmem>>, vector<32x1xf32>
    %5 = vector.shape_cast %4 : vector<32x1xf32> to vector<32x1xf32>
    %6 = vector.broadcast %5 : vector<32x1xf32> to vector<32x8xf32>
    %c0_5 = arith.constant 0 : index
    %c0_6 = arith.constant 0 : index
    %7 = vector.load %arg5[%c0_5, %c0_6] : memref<32x1xf32, #tpu.memory_space<vmem>>, vector<32x1xf32>
    %8 = vector.shape_cast %7 : vector<32x1xf32> to vector<32x1xf32>
    %9 = vector.broadcast %8 : vector<32x1xf32> to vector<32x8xf32>
    %c0_7 = arith.constant 0 : index
    %c0_8 = arith.constant 0 : index
    %10 = vector.load %arg6[%c0_7, %c0_8] : memref<32x1xf32, #tpu.memory_space<vmem>>, vector<32x1xf32>
    %11 = vector.shape_cast %10 : vector<32x1xf32> to vector<32x1xf32>
    %12 = vector.broadcast %11 : vector<32x1xf32> to vector<32x8xf32>
    %cst = arith.constant 0.000000e+00 : f32
    %13 = vector.broadcast %cst : f32 to vector<32x8xf32>
    %c0_i32 = arith.constant 0 : i32
    %14 = arith.truncf %13 : vector<32x8xf32> to vector<32x8xbf16>
    %cst_9 = arith.constant dense<0.000000e+00> : vector<32x8xf32>
    %15 = tpu.matmul %1, %14, %cst_9 {dimension_numbers = #tpu.dot_dimension_numbers<[1], [0], [0], [1], [0, 0, 1, 1], [], []>} : vector<32x32xbf16>, vector<32x8xbf16>, vector<32x8xf32> -> vector<32x8xf32>
    %16 = arith.addf %15, %6 : vector<32x8xf32>
    %cst_10 = arith.constant 5.000000e-01 : f32
    %17 = vector.broadcast %cst_10 : f32 to vector<32x8xf32>
    %18 = arith.mulf %17, %16 : vector<32x8xf32>
    %19 = math.tanh %18 : vector<32x8xf32>
    %cst_11 = arith.constant 5.000000e-01 : f32
    %20 = vector.broadcast %cst_11 : f32 to vector<32x8xf32>
    %21 = arith.mulf %20, %19 : vector<32x8xf32>
    %cst_12 = arith.constant 5.000000e-01 : f32
    %22 = vector.broadcast %cst_12 : f32 to vector<32x8xf32>
    %23 = arith.addf %21, %22 : vector<32x8xf32>
    %24 = arith.index_cast %c0_i32 : i32 to index
    %c0_13 = arith.constant 0 : index
    %c0_14 = arith.constant 0 : index
    %25 = vector.load %arg1[%24, %c0_13, %c0_14] : memref<8x1x8xf32, #tpu.memory_space<vmem>>, vector<1x1x8xf32>
    %26 = vector.shape_cast %25 : vector<1x1x8xf32> to vector<1x8xf32>
    %27 = vector.broadcast %26 : vector<1x8xf32> to vector<32x8xf32>
    %28 = arith.mulf %9, %27 : vector<32x8xf32>
    %29 = arith.addf %28, %12 : vector<32x8xf32>
    %30 = arith.mulf %23, %13 : vector<32x8xf32>
    %31 = arith.truncf %30 : vector<32x8xf32> to vector<32x8xbf16>
    %cst_15 = arith.constant dense<0.000000e+00> : vector<32x8xf32>
    %32 = tpu.matmul %3, %31, %cst_15 {dimension_numbers = #tpu.dot_dimension_numbers<[1], [0], [0], [1], [0, 0, 1, 1], [], []>} : vector<32x32xbf16>, vector<32x8xbf16>, vector<32x8xf32> -> vector<32x8xf32>
    %33 = arith.addf %32, %29 : vector<32x8xf32>
    %cst_16 = arith.constant 0.000000e+00 : f32
    %34 = vector.broadcast %cst_16 : f32 to vector<32x8xf32>
    %35 = arith.maximumf %33, %34 : vector<32x8xf32>
    %36 = arith.subf %35, %13 : vector<32x8xf32>
    %37 = arith.mulf %23, %36 : vector<32x8xf32>
    %38 = arith.addf %13, %37 : vector<32x8xf32>
    %c1_i32 = arith.constant 1 : i32
    %39 = arith.truncf %38 : vector<32x8xf32> to vector<32x8xbf16>
    %cst_17 = arith.constant dense<0.000000e+00> : vector<32x8xf32>
    %40 = tpu.matmul %1, %39, %cst_17 {dimension_numbers = #tpu.dot_dimension_numbers<[1], [0], [0], [1], [0, 0, 1, 1], [], []>} : vector<32x32xbf16>, vector<32x8xbf16>, vector<32x8xf32> -> vector<32x8xf32>
    %41 = arith.addf %40, %6 : vector<32x8xf32>
    %cst_18 = arith.constant 5.000000e-01 : f32
    %42 = vector.broadcast %cst_18 : f32 to vector<32x8xf32>
    %43 = arith.mulf %42, %41 : vector<32x8xf32>
    %44 = math.tanh %43 : vector<32x8xf32>
    %cst_19 = arith.constant 5.000000e-01 : f32
    %45 = vector.broadcast %cst_19 : f32 to vector<32x8xf32>
    %46 = arith.mulf %45, %44 : vector<32x8xf32>
    %cst_20 = arith.constant 5.000000e-01 : f32
    %47 = vector.broadcast %cst_20 : f32 to vector<32x8xf32>
    %48 = arith.addf %46, %47 : vector<32x8xf32>
    %49 = arith.index_cast %c1_i32 : i32 to index
    %c0_21 = arith.constant 0 : index
    %c0_22 = arith.constant 0 : index
    %50 = vector.load %arg1[%49, %c0_21, %c0_22] : memref<8x1x8xf32, #tpu.memory_space<vmem>>, vector<1x1x8xf32>
    %51 = vector.shape_cast %50 : vector<1x1x8xf32> to vector<1x8xf32>
    %52 = vector.broadcast %51 : vector<1x8xf32> to vector<32x8xf32>
    %53 = arith.mulf %9, %52 : vector<32x8xf32>
    %54 = arith.addf %53, %12 : vector<32x8xf32>
    %55 = arith.mulf %48, %38 : vector<32x8xf32>
    %56 = arith.truncf %55 : vector<32x8xf32> to vector<32x8xbf16>
    %cst_23 = arith.constant dense<0.000000e+00> : vector<32x8xf32>
    %57 = tpu.matmul %3, %56, %cst_23 {dimension_numbers = #tpu.dot_dimension_numbers<[1], [0], [0], [1], [0, 0, 1, 1], [], []>} : vector<32x32xbf16>, vector<32x8xbf16>, vector<32x8xf32> -> vector<32x8xf32>
    %58 = arith.addf %57, %54 : vector<32x8xf32>
    %cst_24 = arith.constant 0.000000e+00 : f32
    %59 = vector.broadcast %cst_24 : f32 to vector<32x8xf32>
    %60 = arith.maximumf %58, %59 : vector<32x8xf32>
    %61 = arith.subf %60, %38 : vector<32x8xf32>
    %62 = arith.mulf %48, %61 : vector<32x8xf32>
    %63 = arith.addf %38, %62 : vector<32x8xf32>
    %c2_i32 = arith.constant 2 : i32
    %64 = arith.truncf %63 : vector<32x8xf32> to vector<32x8xbf16>
    %cst_25 = arith.constant dense<0.000000e+00> : vector<32x8xf32>
    %65 = tpu.matmul %1, %64, %cst_25 {dimension_numbers = #tpu.dot_dimension_numbers<[1], [0], [0], [1], [0, 0, 1, 1], [], []>} : vector<32x32xbf16>, vector<32x8xbf16>, vector<32x8xf32> -> vector<32x8xf32>
    %66 = arith.addf %65, %6 : vector<32x8xf32>
    %cst_26 = arith.constant 5.000000e-01 : f32
    %67 = vector.broadcast %cst_26 : f32 to vector<32x8xf32>
    %68 = arith.mulf %67, %66 : vector<32x8xf32>
    %69 = math.tanh %68 : vector<32x8xf32>
    %cst_27 = arith.constant 5.000000e-01 : f32
    %70 = vector.broadcast %cst_27 : f32 to vector<32x8xf32>
    %71 = arith.mulf %70, %69 : vector<32x8xf32>
    %cst_28 = arith.constant 5.000000e-01 : f32
    %72 = vector.broadcast %cst_28 : f32 to vector<32x8xf32>
    %73 = arith.addf %71, %72 : vector<32x8xf32>
    %74 = arith.index_cast %c2_i32 : i32 to index
    %c0_29 = arith.constant 0 : index
    %c0_30 = arith.constant 0 : index
    %75 = vector.load %arg1[%74, %c0_29, %c0_30] : memref<8x1x8xf32, #tpu.memory_space<vmem>>, vector<1x1x8xf32>
    %76 = vector.shape_cast %75 : vector<1x1x8xf32> to vector<1x8xf32>
    %77 = vector.broadcast %76 : vector<1x8xf32> to vector<32x8xf32>
    %78 = arith.mulf %9, %77 : vector<32x8xf32>
    %79 = arith.addf %78, %12 : vector<32x8xf32>
    %80 = arith.mulf %73, %63 : vector<32x8xf32>
    %81 = arith.truncf %80 : vector<32x8xf32> to vector<32x8xbf16>
    %cst_31 = arith.constant dense<0.000000e+00> : vector<32x8xf32>
    %82 = tpu.matmul %3, %81, %cst_31 {dimension_numbers = #tpu.dot_dimension_numbers<[1], [0], [0], [1], [0, 0, 1, 1], [], []>} : vector<32x32xbf16>, vector<32x8xbf16>, vector<32x8xf32> -> vector<32x8xf32>
    %83 = arith.addf %82, %79 : vector<32x8xf32>
    %cst_32 = arith.constant 0.000000e+00 : f32
    %84 = vector.broadcast %cst_32 : f32 to vector<32x8xf32>
    %85 = arith.maximumf %83, %84 : vector<32x8xf32>
    %86 = arith.subf %85, %63 : vector<32x8xf32>
    %87 = arith.mulf %73, %86 : vector<32x8xf32>
    %88 = arith.addf %63, %87 : vector<32x8xf32>
    %c3_i32 = arith.constant 3 : i32
    %89 = arith.truncf %88 : vector<32x8xf32> to vector<32x8xbf16>
    %cst_33 = arith.constant dense<0.000000e+00> : vector<32x8xf32>
    %90 = tpu.matmul %1, %89, %cst_33 {dimension_numbers = #tpu.dot_dimension_numbers<[1], [0], [0], [1], [0, 0, 1, 1], [], []>} : vector<32x32xbf16>, vector<32x8xbf16>, vector<32x8xf32> -> vector<32x8xf32>
    %91 = arith.addf %90, %6 : vector<32x8xf32>
    %cst_34 = arith.constant 5.000000e-01 : f32
    %92 = vector.broadcast %cst_34 : f32 to vector<32x8xf32>
    %93 = arith.mulf %92, %91 : vector<32x8xf32>
    %94 = math.tanh %93 : vector<32x8xf32>
    %cst_35 = arith.constant 5.000000e-01 : f32
    %95 = vector.broadcast %cst_35 : f32 to vector<32x8xf32>
    %96 = arith.mulf %95, %94 : vector<32x8xf32>
    %cst_36 = arith.constant 5.000000e-01 : f32
    %97 = vector.broadcast %cst_36 : f32 to vector<32x8xf32>
    %98 = arith.addf %96, %97 : vector<32x8xf32>
    %99 = arith.index_cast %c3_i32 : i32 to index
    %c0_37 = arith.constant 0 : index
    %c0_38 = arith.constant 0 : index
    %100 = vector.load %arg1[%99, %c0_37, %c0_38] : memref<8x1x8xf32, #tpu.memory_space<vmem>>, vector<1x1x8xf32>
    %101 = vector.shape_cast %100 : vector<1x1x8xf32> to vector<1x8xf32>
    %102 = vector.broadcast %101 : vector<1x8xf32> to vector<32x8xf32>
    %103 = arith.mulf %9, %102 : vector<32x8xf32>
    %104 = arith.addf %103, %12 : vector<32x8xf32>
    %105 = arith.mulf %98, %88 : vector<32x8xf32>
    %106 = arith.truncf %105 : vector<32x8xf32> to vector<32x8xbf16>
    %cst_39 = arith.constant dense<0.000000e+00> : vector<32x8xf32>
    %107 = tpu.matmul %3, %106, %cst_39 {dimension_numbers = #tpu.dot_dimension_numbers<[1], [0], [0], [1], [0, 0, 1, 1], [], []>} : vector<32x32xbf16>, vector<32x8xbf16>, vector<32x8xf32> -> vector<32x8xf32>
    %108 = arith.addf %107, %104 : vector<32x8xf32>
    %cst_40 = arith.constant 0.000000e+00 : f32
    %109 = vector.broadcast %cst_40 : f32 to vector<32x8xf32>
    %110 = arith.maximumf %108, %109 : vector<32x8xf32>
    %111 = arith.subf %110, %88 : vector<32x8xf32>
    %112 = arith.mulf %98, %111 : vector<32x8xf32>
    %113 = arith.addf %88, %112 : vector<32x8xf32>
    %c4_i32 = arith.constant 4 : i32
    %114 = arith.truncf %113 : vector<32x8xf32> to vector<32x8xbf16>
    %cst_41 = arith.constant dense<0.000000e+00> : vector<32x8xf32>
    %115 = tpu.matmul %1, %114, %cst_41 {dimension_numbers = #tpu.dot_dimension_numbers<[1], [0], [0], [1], [0, 0, 1, 1], [], []>} : vector<32x32xbf16>, vector<32x8xbf16>, vector<32x8xf32> -> vector<32x8xf32>
    %116 = arith.addf %115, %6 : vector<32x8xf32>
    %cst_42 = arith.constant 5.000000e-01 : f32
    %117 = vector.broadcast %cst_42 : f32 to vector<32x8xf32>
    %118 = arith.mulf %117, %116 : vector<32x8xf32>
    %119 = math.tanh %118 : vector<32x8xf32>
    %cst_43 = arith.constant 5.000000e-01 : f32
    %120 = vector.broadcast %cst_43 : f32 to vector<32x8xf32>
    %121 = arith.mulf %120, %119 : vector<32x8xf32>
    %cst_44 = arith.constant 5.000000e-01 : f32
    %122 = vector.broadcast %cst_44 : f32 to vector<32x8xf32>
    %123 = arith.addf %121, %122 : vector<32x8xf32>
    %124 = arith.index_cast %c4_i32 : i32 to index
    %c0_45 = arith.constant 0 : index
    %c0_46 = arith.constant 0 : index
    %125 = vector.load %arg1[%124, %c0_45, %c0_46] : memref<8x1x8xf32, #tpu.memory_space<vmem>>, vector<1x1x8xf32>
    %126 = vector.shape_cast %125 : vector<1x1x8xf32> to vector<1x8xf32>
    %127 = vector.broadcast %126 : vector<1x8xf32> to vector<32x8xf32>
    %128 = arith.mulf %9, %127 : vector<32x8xf32>
    %129 = arith.addf %128, %12 : vector<32x8xf32>
    %130 = arith.mulf %123, %113 : vector<32x8xf32>
    %131 = arith.truncf %130 : vector<32x8xf32> to vector<32x8xbf16>
    %cst_47 = arith.constant dense<0.000000e+00> : vector<32x8xf32>
    %132 = tpu.matmul %3, %131, %cst_47 {dimension_numbers = #tpu.dot_dimension_numbers<[1], [0], [0], [1], [0, 0, 1, 1], [], []>} : vector<32x32xbf16>, vector<32x8xbf16>, vector<32x8xf32> -> vector<32x8xf32>
    %133 = arith.addf %132, %129 : vector<32x8xf32>
    %cst_48 = arith.constant 0.000000e+00 : f32
    %134 = vector.broadcast %cst_48 : f32 to vector<32x8xf32>
    %135 = arith.maximumf %133, %134 : vector<32x8xf32>
    %136 = arith.subf %135, %113 : vector<32x8xf32>
    %137 = arith.mulf %123, %136 : vector<32x8xf32>
    %138 = arith.addf %113, %137 : vector<32x8xf32>
    %c5_i32 = arith.constant 5 : i32
    %139 = arith.truncf %138 : vector<32x8xf32> to vector<32x8xbf16>
    %cst_49 = arith.constant dense<0.000000e+00> : vector<32x8xf32>
    %140 = tpu.matmul %1, %139, %cst_49 {dimension_numbers = #tpu.dot_dimension_numbers<[1], [0], [0], [1], [0, 0, 1, 1], [], []>} : vector<32x32xbf16>, vector<32x8xbf16>, vector<32x8xf32> -> vector<32x8xf32>
    %141 = arith.addf %140, %6 : vector<32x8xf32>
    %cst_50 = arith.constant 5.000000e-01 : f32
    %142 = vector.broadcast %cst_50 : f32 to vector<32x8xf32>
    %143 = arith.mulf %142, %141 : vector<32x8xf32>
    %144 = math.tanh %143 : vector<32x8xf32>
    %cst_51 = arith.constant 5.000000e-01 : f32
    %145 = vector.broadcast %cst_51 : f32 to vector<32x8xf32>
    %146 = arith.mulf %145, %144 : vector<32x8xf32>
    %cst_52 = arith.constant 5.000000e-01 : f32
    %147 = vector.broadcast %cst_52 : f32 to vector<32x8xf32>
    %148 = arith.addf %146, %147 : vector<32x8xf32>
    %149 = arith.index_cast %c5_i32 : i32 to index
    %c0_53 = arith.constant 0 : index
    %c0_54 = arith.constant 0 : index
    %150 = vector.load %arg1[%149, %c0_53, %c0_54] : memref<8x1x8xf32, #tpu.memory_space<vmem>>, vector<1x1x8xf32>
    %151 = vector.shape_cast %150 : vector<1x1x8xf32> to vector<1x8xf32>
    %152 = vector.broadcast %151 : vector<1x8xf32> to vector<32x8xf32>
    %153 = arith.mulf %9, %152 : vector<32x8xf32>
    %154 = arith.addf %153, %12 : vector<32x8xf32>
    %155 = arith.mulf %148, %138 : vector<32x8xf32>
    %156 = arith.truncf %155 : vector<32x8xf32> to vector<32x8xbf16>
    %cst_55 = arith.constant dense<0.000000e+00> : vector<32x8xf32>
    %157 = tpu.matmul %3, %156, %cst_55 {dimension_numbers = #tpu.dot_dimension_numbers<[1], [0], [0], [1], [0, 0, 1, 1], [], []>} : vector<32x32xbf16>, vector<32x8xbf16>, vector<32x8xf32> -> vector<32x8xf32>
    %158 = arith.addf %157, %154 : vector<32x8xf32>
    %cst_56 = arith.constant 0.000000e+00 : f32
    %159 = vector.broadcast %cst_56 : f32 to vector<32x8xf32>
    %160 = arith.maximumf %158, %159 : vector<32x8xf32>
    %161 = arith.subf %160, %138 : vector<32x8xf32>
    %162 = arith.mulf %148, %161 : vector<32x8xf32>
    %163 = arith.addf %138, %162 : vector<32x8xf32>
    %c6_i32 = arith.constant 6 : i32
    %164 = arith.truncf %163 : vector<32x8xf32> to vector<32x8xbf16>
    %cst_57 = arith.constant dense<0.000000e+00> : vector<32x8xf32>
    %165 = tpu.matmul %1, %164, %cst_57 {dimension_numbers = #tpu.dot_dimension_numbers<[1], [0], [0], [1], [0, 0, 1, 1], [], []>} : vector<32x32xbf16>, vector<32x8xbf16>, vector<32x8xf32> -> vector<32x8xf32>
    %166 = arith.addf %165, %6 : vector<32x8xf32>
    %cst_58 = arith.constant 5.000000e-01 : f32
    %167 = vector.broadcast %cst_58 : f32 to vector<32x8xf32>
    %168 = arith.mulf %167, %166 : vector<32x8xf32>
    %169 = math.tanh %168 : vector<32x8xf32>
    %cst_59 = arith.constant 5.000000e-01 : f32
    %170 = vector.broadcast %cst_59 : f32 to vector<32x8xf32>
    %171 = arith.mulf %170, %169 : vector<32x8xf32>
    %cst_60 = arith.constant 5.000000e-01 : f32
    %172 = vector.broadcast %cst_60 : f32 to vector<32x8xf32>
    %173 = arith.addf %171, %172 : vector<32x8xf32>
    %174 = arith.index_cast %c6_i32 : i32 to index
    %c0_61 = arith.constant 0 : index
    %c0_62 = arith.constant 0 : index
    %175 = vector.load %arg1[%174, %c0_61, %c0_62] : memref<8x1x8xf32, #tpu.memory_space<vmem>>, vector<1x1x8xf32>
    %176 = vector.shape_cast %175 : vector<1x1x8xf32> to vector<1x8xf32>
    %177 = vector.broadcast %176 : vector<1x8xf32> to vector<32x8xf32>
    %178 = arith.mulf %9, %177 : vector<32x8xf32>
    %179 = arith.addf %178, %12 : vector<32x8xf32>
    %180 = arith.mulf %173, %163 : vector<32x8xf32>
    %181 = arith.truncf %180 : vector<32x8xf32> to vector<32x8xbf16>
    %cst_63 = arith.constant dense<0.000000e+00> : vector<32x8xf32>
    %182 = tpu.matmul %3, %181, %cst_63 {dimension_numbers = #tpu.dot_dimension_numbers<[1], [0], [0], [1], [0, 0, 1, 1], [], []>} : vector<32x32xbf16>, vector<32x8xbf16>, vector<32x8xf32> -> vector<32x8xf32>
    %183 = arith.addf %182, %179 : vector<32x8xf32>
    %cst_64 = arith.constant 0.000000e+00 : f32
    %184 = vector.broadcast %cst_64 : f32 to vector<32x8xf32>
    %185 = arith.maximumf %183, %184 : vector<32x8xf32>
    %186 = arith.subf %185, %163 : vector<32x8xf32>
    %187 = arith.mulf %173, %186 : vector<32x8xf32>
    %188 = arith.addf %163, %187 : vector<32x8xf32>
    %c7_i32 = arith.constant 7 : i32
    %189 = arith.truncf %188 : vector<32x8xf32> to vector<32x8xbf16>
    %cst_65 = arith.constant dense<0.000000e+00> : vector<32x8xf32>
    %190 = tpu.matmul %1, %189, %cst_65 {dimension_numbers = #tpu.dot_dimension_numbers<[1], [0], [0], [1], [0, 0, 1, 1], [], []>} : vector<32x32xbf16>, vector<32x8xbf16>, vector<32x8xf32> -> vector<32x8xf32>
    %191 = arith.addf %190, %6 : vector<32x8xf32>
    %cst_66 = arith.constant 5.000000e-01 : f32
    %192 = vector.broadcast %cst_66 : f32 to vector<32x8xf32>
    %193 = arith.mulf %192, %191 : vector<32x8xf32>
    %194 = math.tanh %193 : vector<32x8xf32>
    %cst_67 = arith.constant 5.000000e-01 : f32
    %195 = vector.broadcast %cst_67 : f32 to vector<32x8xf32>
    %196 = arith.mulf %195, %194 : vector<32x8xf32>
    %cst_68 = arith.constant 5.000000e-01 : f32
    %197 = vector.broadcast %cst_68 : f32 to vector<32x8xf32>
    %198 = arith.addf %196, %197 : vector<32x8xf32>
    %199 = arith.index_cast %c7_i32 : i32 to index
    %c0_69 = arith.constant 0 : index
    %c0_70 = arith.constant 0 : index
    %200 = vector.load %arg1[%199, %c0_69, %c0_70] : memref<8x1x8xf32, #tpu.memory_space<vmem>>, vector<1x1x8xf32>
    %201 = vector.shape_cast %200 : vector<1x1x8xf32> to vector<1x8xf32>
    %202 = vector.broadcast %201 : vector<1x8xf32> to vector<32x8xf32>
    %203 = arith.mulf %9, %202 : vector<32x8xf32>
    %204 = arith.addf %203, %12 : vector<32x8xf32>
    %205 = arith.mulf %198, %188 : vector<32x8xf32>
    %206 = arith.truncf %205 : vector<32x8xf32> to vector<32x8xbf16>
    %cst_71 = arith.constant dense<0.000000e+00> : vector<32x8xf32>
    %207 = tpu.matmul %3, %206, %cst_71 {dimension_numbers = #tpu.dot_dimension_numbers<[1], [0], [0], [1], [0, 0, 1, 1], [], []>} : vector<32x32xbf16>, vector<32x8xbf16>, vector<32x8xf32> -> vector<32x8xf32>
    %208 = arith.addf %207, %204 : vector<32x8xf32>
    %cst_72 = arith.constant 0.000000e+00 : f32
    %209 = vector.broadcast %cst_72 : f32 to vector<32x8xf32>
    %210 = arith.maximumf %208, %209 : vector<32x8xf32>
    %211 = arith.subf %210, %188 : vector<32x8xf32>
    %212 = arith.mulf %198, %211 : vector<32x8xf32>
    %213 = arith.addf %188, %212 : vector<32x8xf32>
    %c8_i32 = arith.constant 8 : i32
    %c0_73 = arith.constant 0 : index
    %c0_74 = arith.constant 0 : index
    %214 = vector.load %arg7[%c0_73, %c0_74] : memref<1x32xf32, #tpu.memory_space<vmem>>, vector<1x32xf32>
    %215 = arith.truncf %214 : vector<1x32xf32> to vector<1x32xbf16>
    %216 = arith.truncf %213 : vector<32x8xf32> to vector<32x8xbf16>
    %cst_75 = arith.constant dense<0.000000e+00> : vector<1x8xf32>
    %217 = tpu.matmul %215, %216, %cst_75 {dimension_numbers = #tpu.dot_dimension_numbers<[1], [0], [0], [1], [0, 0, 1, 1], [], []>} : vector<1x32xbf16>, vector<32x8xbf16>, vector<1x8xf32> -> vector<1x8xf32>
    %c0_76 = arith.constant 0 : index
    %c0_77 = arith.constant 0 : index
    %218 = vector.load %arg8[%c0_76, %c0_77] : memref<1x1xf32, #tpu.memory_space<vmem>>, vector<1x1xf32>
    %219 = vector.broadcast %218 : vector<1x1xf32> to vector<1x8xf32>
    %220 = arith.addf %217, %219 : vector<1x8xf32>
    %c0_78 = arith.constant 0 : index
    %c0_79 = arith.constant 0 : index
    %221 = vector.load %arg9[%c0_78, %c0_79] : memref<1x8xf32, #tpu.memory_space<vmem>>, vector<1x8xf32>
    tpu.vector_store %arg9[%c0_78, %c0_79], %220 {strides = array<i32>} : memref<1x8xf32, #tpu.memory_space<vmem>>, vector<1x8xf32>,
    return
  }
  func.func @transform_0(%arg0: i32) -> (i32, i32, i32) {
    %c0_i32 = arith.constant 0 : i32
    %c0_i32_0 = arith.constant 0 : i32
    %c0_i32_1 = arith.constant 0 : i32
    return %c0_i32, %c0_i32_0, %arg0 : i32, i32, i32
  }
  func.func @transform_1(%arg0: i32) -> (i32, i32) {
    %c0_i32 = arith.constant 0 : i32
    %c0_i32_0 = arith.constant 0 : i32
    %c0_i32_1 = arith.constant 0 : i32
    return %c0_i32, %c0_i32_0 : i32, i32
  }
  func.func @transform_2(%arg0: i32) -> (i32, i32) {
    %c0_i32 = arith.constant 0 : i32
    %c0_i32_0 = arith.constant 0 : i32
    %c0_i32_1 = arith.constant 0 : i32
    return %c0_i32, %c0_i32_0 : i32, i32
  }
  func.func @transform_3(%arg0: i32) -> (i32, i32) {
    %c0_i32 = arith.constant 0 : i32
    %c0_i32_0 = arith.constant 0 : i32
    %c0_i32_1 = arith.constant 0 : i32
    return %c0_i32, %c0_i32_0 : i32, i32
  }
  func.func @transform_4(%arg0: i32) -> (i32, i32) {
    %c0_i32 = arith.constant 0 : i32
    %c0_i32_0 = arith.constant 0 : i32
    %c0_i32_1 = arith.constant 0 : i32
    return %c0_i32, %c0_i32_0 : i32, i32
  }
  func.func @transform_5(%arg0: i32) -> (i32, i32) {
    %c0_i32 = arith.constant 0 : i32
    %c0_i32_0 = arith.constant 0 : i32
    %c0_i32_1 = arith.constant 0 : i32
    return %c0_i32, %c0_i32_0 : i32, i32
  }
  func.func @transform_6(%arg0: i32) -> (i32, i32) {
    %c0_i32 = arith.constant 0 : i32
    %c0_i32_0 = arith.constant 0 : i32
    %c0_i32_1 = arith.constant 0 : i32
    return %c0_i32, %c0_i32_0 : i32, i32
  }
  func.func @transform_7(%arg0: i32) -> (i32, i32) {
    %c0_i32 = arith.constant 0 : i32
    %c0_i32_0 = arith.constant 0 : i32
    %c0_i32_1 = arith.constant 0 : i32
    return %c0_i32, %c0_i32_0 : i32, i32
  }
  func.func @transform_8(%arg0: i32) -> (i32, i32) {
    %c0_i32 = arith.constant 0 : i32
    %c0_i32_0 = arith.constant 0 : i32
    return %c0_i32, %arg0 : i32, i32
  }
}

</mosaic_0001>

<bundles_post_ra>
// kernel: tpu_custom_call.1
= control target key start
LH: loop header
LB: loop body
LE: loop exit
PB: predicated region body
PF: predicated region fallthrough
CT: control target
= control target key end

     0   :  { %s2366_s0 = inlined_call_operand.vmem [shape: f32[8,1,8], index: 0, kind: input, shape index: {}]   ;;  %s2367_s1 = inlined_call_operand.vmem [shape: f32[32,32], index: 1, kind: input, shape index: {}]   ;;  %s2368_s2 = inlined_call_operand.vmem [shape: f32[32,1], index: 2, kind: input, shape index: {}]   ;;  %s2369_s3 = inlined_call_operand.vmem [shape: f32[32,32], index: 3, kind: input, shape index: {}]   ;;  %s2370_s4 = inlined_call_operand.vmem [shape: f32[32,1], index: 4, kind: input, shape index: {}]   ;;  %s2371_s5 = inlined_call_operand.vmem [shape: f32[32,1], index: 5, kind: input, shape index: {}]   ;;  %s2372_s6 = inlined_call_operand.vmem [shape: f32[1,32], index: 6, kind: input, shape index: {}]   ;;  %s2373_s7 = inlined_call_operand.<no memory space> [shape: f32[1,1], index: 7, kind: input, shape index: {}]   ;;  %s2374_s8 = inlined_call_operand.hbm [shape: f32[1,8], index: 8, kind: output, shape index: {}]  }
   0x1   :  { %v13_v0 = vstv %s2373_s7 }
   0x2   :  { %14 = vst [vmem:[#allocation2] sm:$0x1] %v13_v0 }
   0x3   :  { %v33_v1 = vld [vmem:[%s2367_s1] sm:$0xff]  ;;  %v34_v2 = vld [vmem:[%s2367_s1 + $0x8] sm:$0xff]  ;;  %vm117_vm0 = vcmask 261120   ;;  %v35_v3 = vld [vmem:[%s2367_s1 + $0x10] sm:$0xff]  ;;  %v1770_v4 = vmov 0  }
   0x4   :  { %1542 = vmatprep.subr.bf16.mxu0 %v1770_v4  ;;  %v1831_v5 = vpack.c.bf16 %v34_v2, %v33_v1  ;;  %v36_v6 = vld [vmem:[%s2367_s1 + $0x18] sm:$0xff]  ;;  %1680 = vset.pattern.permute.xlu0 %v1770_v4  ;;  %v45_v7 = vld [vmem:[%s2368_s2] sm:$0xff]  ;;  %v47_v9 = vld [vmem:[%s2368_s2 + $0x10] sm:$0xff] }
   0x5   :  { %1543 = vmatpush3.bf16.msra.mxu0 %v1770_v4  ;;  %v1839_v8 = vpack.c.bf16 %v36_v6, %v35_v3  ;;  %51 = vperm.xlu0 %1680, %v45_v7   ;;  %v46_v10 = vld [vmem:[%s2368_s2 + $0x8] sm:$0xff]  ;;  %v48_v11 = vld [vmem:[%s2368_s2 + $0x18] sm:$0xff] }
   0x6   :  { %1544 = vmatprep.mubr.msk.bf16.mxu0 %vm117_vm0, %v1831_v5  ;;  %1681 = vset.pattern.permute.xlu1 %v1770_v4 }
   0x7   :  { %61 = vperm.xlu1 %1681, %v47_v9  }
   0x8   :  { %1545 = vmatmul.mubr.msk.bf16.vlgmr.msra.gmra.mrb[0].mxu0 %vm117_vm0, %v1839_v8 }
   0x9   :  { %15 = vsyncpa [#allocation4], 0  ;;  %56 = vperm.xlu0 %1680, %v46_v10   ;;  %1560 = vmatprep.mubr.msk.bf16.mxu0 %vm117_vm0, %v1831_v5  ;;  %v69_v12 = vld [vmem:[%s2370_s4] sm:$0xff]  ;;  %v70_v13 = vld [vmem:[%s2370_s4 + $0x8] sm:$0xff]  ;;  %vm1772_vm1 = vmmov 0   ;;  %s1773_s11 = smov [#allocation3]  }
   0xa   :  { %v93_v14 = vld [vmem:[%s2371_s5] sm:$0xff]  ;;  %v94_v15 = vld [vmem:[%s2371_s5 + $0x8] sm:$0xff]  ;;  %v71_v16 = vld [vmem:[%s2370_s4 + $0x10] sm:$0xff]  ;;  %s1420_s12 = sshll.u32 %s1773_s11, 4  ;;  %vm1412_vm2 = vcmask 57344   ;;  %s1421_s12 = int_to_ptr.vmem [resolvable:$true] %s1420_s12 }
   0xb   :  { %66 = vperm.xlu1 %1681, %v48_v11   ;;  %v72_v17 = vld [vmem:[%s2370_s4 + $0x18] sm:$0xff]  ;;  %v95_v18 = vld [vmem:[%s2371_s5 + $0x10] sm:$0xff]  ;;  %v1359_v20 = vld [vmem:[#allocation2] sm:$0x1]  ;;  %s1750_s13 = scalar_lea.vmem %s1421_s12, 32  ;;  %p1751_p1 = scmp.lt.s32.totalorder %s1421_s12, %s1421_s12 }
   0xc   :  { %v96_v19 = vld [vmem:[%s2371_s5 + $0x18] sm:$0xff]  ;;  %v39_v21 = vld [vmem:[%s2369_s3] sm:$0xff]  ;;  %v40_v22 = vld [vmem:[%s2369_s3 + $0x8] sm:$0xff] }
   0xd   :  { %75 = vperm.xlu0 %1680, %v69_v12   ;;  %v1886_v23 = vpack.c.bf16 %v40_v22, %v39_v21  ;;  %v1436_v27 = vld [vmem:[%s2366_s0 + $0x1] ss:$0 sm:$0xff]  ;;  %v1442_v29 = vld [vmem:[%s2366_s0 + $0x2] ss:$0 sm:$0xff]  ;;  %v1448_v30 = vld [vmem:[%s2366_s0 + $0x3] ss:$0 sm:$0xff] }
   0xe   :  { %v1454_v31 = vld [vmem:[%s2366_s0 + $0x4] ss:$0 sm:$0xff]  ;;  %v1460_v32 = vld [vmem:[%s2366_s0 + $0x5] ss:$0 sm:$0xff]  ;;  %v1466_v33 = vld [vmem:[%s2366_s0 + $0x6] ss:$0 sm:$0xff] }
   0xf   :  { %80 = vperm.xlu1 %1681, %v70_v13   ;;  %1552 = vmatprep.mubr.msk.bf16.mxu1 %vm117_vm0, %v1886_v23  ;;  %v1472_v34 = vld [vmem:[%s2366_s0 + $0x7] ss:$0 sm:$0xff] }
  0x11   :  { %99 = vperm.xlu0 %1680, %v93_v14  }
  0x13   :  { %104 = vperm.xlu1 %1681, %v94_v15  }
  0x15   :  { %85 = vperm.xlu0 %1680, %v71_v16  }
  0x17   :  { %90 = vperm.xlu1 %1681, %v72_v17  }
  0x19   :  { %109 = vperm.xlu0 %1680, %v95_v18  }
  0x1b   :  { %114 = vperm.xlu1 %1681, %v96_v19  }
  0x1d   :  { %1362 = vperm.xlu0 %1680, %v1359_v20  }
  0x84   :  { %v1890_v24 = vpop.permute.xlu0 %51 }
  0x86   :  { %v1892_v25 = vpop.permute.xlu1 %61 }
  0x88   :  { %v1894_v26 = vpop.permute.xlu0 %56 }
  0x8a   :  { %v1899_v28 = vpop.permute.xlu1 %66 }
  0x8c   :  { %v1919_v35 = vpop.permute.xlu0 %75 }
  0x8d   :  { %v352_v36 = vmul.f32 %v1436_v27, %v1919_v35  ;;  %v506_v37 = vmul.f32 %v1442_v29, %v1919_v35  ;;  %v660_v38 = vmul.f32 %v1448_v30, %v1919_v35  ;;  %v814_v40 = vmul.f32 %v1454_v31, %v1919_v35 }
  0x8e   :  { %v1924_v39 = vpop.permute.xlu1 %80  ;;  %v968_v41 = vmul.f32 %v1460_v32, %v1919_v35  ;;  %v1122_v42 = vmul.f32 %v1466_v33, %v1919_v35  ;;  %v1276_v43 = vmul.f32 %v1472_v34, %v1919_v35 }
  0x8f   :  { %v353_v44 = vmul.f32 %v1436_v27, %v1924_v39  ;;  %v507_v45 = vmul.f32 %v1442_v29, %v1924_v39  ;;  %v661_v46 = vmul.f32 %v1448_v30, %v1924_v39  ;;  %v815_v48 = vmul.f32 %v1454_v31, %v1924_v39 }
  0x90   :  { %v1933_v47 = vpop.permute.xlu0 %99  ;;  %v969_v49 = vmul.f32 %v1460_v32, %v1924_v39  ;;  %v1123_v50 = vmul.f32 %v1466_v33, %v1924_v39  ;;  %v1277_v51 = vmul.f32 %v1472_v34, %v1924_v39 }
  0x91   :  { %v1940_v52 = vadd.f32 %v352_v36, %v1933_v47  ;;  %v1943_v53 = vadd.f32 %v506_v37, %v1933_v47  ;;  %v1946_v54 = vadd.f32 %v660_v38, %v1933_v47  ;;  %v1951_v56 = vadd.f32 %v814_v40, %v1933_v47 }
  0x92   :  { %v1948_v55 = vpop.permute.xlu1 %104  ;;  %v1954_v57 = vadd.f32 %v968_v41, %v1933_v47  ;;  %v1957_v58 = vadd.f32 %v1122_v42, %v1933_v47  ;;  %v1960_v59 = vadd.f32 %v1276_v43, %v1933_v47 }
  0x93   :  { %v1963_v60 = vadd.f32 %v353_v44, %v1948_v55  ;;  %v1966_v61 = vadd.f32 %v507_v45, %v1948_v55  ;;  %v1969_v62 = vadd.f32 %v661_v46, %v1948_v55  ;;  %v1974_v0 = vadd.f32 %v815_v48, %v1948_v55 }
  0x94   :  { %v1971_v63 = vpop.permute.xlu0 %85  ;;  %v1977_v1 = vadd.f32 %v969_v49, %v1948_v55  ;;  %v1980_v2 = vadd.f32 %v1123_v50, %v1948_v55  ;;  %v1983_v3 = vadd.f32 %v1277_v51, %v1948_v55 }
  0x95   :  { %v354_v4 = vmul.f32 %v1436_v27, %v1971_v63  ;;  %v508_v6 = vmul.f32 %v1442_v29, %v1971_v63  ;;  %v662_v7 = vmul.f32 %v1448_v30, %v1971_v63  ;;  %v816_v10 = vmul.f32 %v1454_v31, %v1971_v63 }
  0x96   :  { %2375 = vst [vmem:[#allocation6_spill] sm:$0xff] %v1983_v3  ;;  %v1988_v9 = vpop.permute.xlu1 %90  ;;  %v970_v11 = vmul.f32 %v1460_v32, %v1971_v63  ;;  %v1124_v12 = vmul.f32 %v1466_v33, %v1971_v63  ;;  %v1278_v13 = vmul.f32 %v1472_v34, %v1971_v63 }
  0x97   :  { %v355_v14 = vmul.f32 %v1436_v27, %v1988_v9  ;;  %v509_v15 = vmul.f32 %v1442_v29, %v1988_v9  ;;  %v663_v16 = vmul.f32 %v1448_v30, %v1988_v9  ;;  %v817_v18 = vmul.f32 %v1454_v31, %v1988_v9 }
  0x98   :  { %v1997_v17 = vpop.permute.xlu0 %109  ;;  %v971_v19 = vmul.f32 %v1460_v32, %v1988_v9  ;;  %v1125_v20 = vmul.f32 %v1466_v33, %v1988_v9  ;;  %v1279_v21 = vmul.f32 %v1472_v34, %v1988_v9 }
  0x99   :  { %v2004_v22 = vadd.f32 %v354_v4, %v1997_v17  ;;  %v2007_v36 = vadd.f32 %v508_v6, %v1997_v17  ;;  %v2010_v27 = vadd.f32 %v662_v7, %v1997_v17  ;;  %v2015_v30 = vadd.f32 %v816_v10, %v1997_v17 }
  0x9a   :  { %v2012_v29 = vpop.permute.xlu1 %114  ;;  %v2018_v31 = vadd.f32 %v970_v11, %v1997_v17  ;;  %v2021_v32 = vadd.f32 %v1124_v12, %v1997_v17  ;;  %v2024_v33 = vadd.f32 %v1278_v13, %v1997_v17 }
  0x9b   :  { %v2027_v34 = vadd.f32 %v355_v14, %v2012_v29  ;;  %v2030_v37 = vadd.f32 %v509_v15, %v2012_v29  ;;  %v2033_v38 = vadd.f32 %v663_v16, %v2012_v29  ;;  %v2036_v40 = vadd.f32 %v817_v18, %v2012_v29 }
  0x9c   :  { %v2039_v41 = vadd.f32 %v971_v19, %v2012_v29  ;;  %v2042_v42 = vadd.f32 %v1125_v20, %v2012_v29  ;;  %v2045_v43 = vadd.f32 %v1279_v21, %v2012_v29 }
  0xdb   :  { %v1546_v44 = vpop.f32.mrb[0].mxu0 }
  0xdc   :  { %v167_v45 = vadd.f32 %v1546_v44, %v1892_v25  ;;  %v158_v46 = vpop.f32.mrb[1].mxu0 }
  0xdd   :  { %v159_v48 = vadd.f32 %v158_v46, %v1890_v24  ;;  %v1547_v49 = vpop.f32.mrb[2].mxu0 }
  0xde   :  { %v175_v50 = vmul.f32 0.5, %v167_v45  ;;  %v170_v51 = vadd.f32 %v1547_v49, %v1899_v28  ;;  %v161_v4 = vpop.f32.mrb[3].mxu0 }
  0xdf   :  { %v173_v6 = vmul.f32 0.5, %v159_v48  ;;  %v162_v7 = vadd.f32 %v161_v4, %v1894_v26 }
  0xe0   :  { %1682 = vtanh.f32 %v175_v50  ;;  %v176_v10 = vmul.f32 0.5, %v170_v51 }
  0xe1   :  { %1684 = vtanh.f32 %v173_v6  ;;  %v174_v11 = vmul.f32 0.5, %v162_v7  ;;  %v41_v7 = vld [vmem:[%s2369_s3 + $0x10] sm:$0xff] }
  0xe2   :  { %1686 = vtanh.f32 %v176_v10  ;;  %v42_v10 = vld [vmem:[%s2369_s3 + $0x18] sm:$0xff] }
  0xe3   :  { %1688 = vtanh.f32 %v174_v11  ;;  %v2057_v11 = vpack.c.bf16 %v42_v10, %v41_v7 }
  0xea   :  { %v1683_v12 = vpop.eup %1682 }
  0xeb   :  { %v1685_v13 = vpop.eup %1684  ;;  %v183_v15 = vmul.f32 0.5, %v1683_v12  ;;  %v1430_v12 = vld [vmem:[%s2366_s0] ss:$0 sm:$0xff] }
  0xec   :  { %v1687_v14 = vpop.eup %1686  ;;  %v181_v16 = vmul.f32 0.5, %v1685_v13  ;;  %v198_v13 = vmul.f32 %v1430_v12, %v1971_v63 }
  0xed   :  { %v1689_v18 = vpop.eup %1688  ;;  %v184_v19 = vmul.f32 0.5, %v1687_v14  ;;  %v187_v45 = vadd.f32 0.5, %v183_v15  ;;  %v196_v14 = vmul.f32 %v1430_v12, %v1919_v35  ;;  %v199_v15 = vmul.f32 %v1430_v12, %v1988_v9 }
  0xee   :  { %v185_v20 = vadd.f32 0.5, %v181_v16  ;;  %v182_v21 = vmul.f32 0.5, %v1689_v18  ;;  %v197_v16 = vmul.f32 %v1430_v12, %v1924_v39  ;;  %v202_v18 = vadd.f32 %v198_v13, %v1997_v17 }
  0xef   :  { %v188_v44 = vadd.f32 0.5, %v184_v19  ;;  %v206_v4 = vmul.f32 0.0, %v187_v45 }
  0xf0   :  { %v186_v46 = vadd.f32 0.5, %v182_v21  ;;  %v204_v48 = vmul.f32 0.0, %v185_v20  ;;  %v200_v21 = vadd.f32 %v196_v14, %v1933_v47 }
  0xf1   :  { %v207_v50 = vmul.f32 0.0, %v188_v44 }
  0xf2   :  { %v205_v49 = vmul.f32 0.0, %v186_v46 }
  0xf3   :  { %v209_v6 = vpack.c.bf16 %v207_v50, %v206_v4 }
  0xf4   :  { %v208_v51 = vpack.c.bf16 %v205_v49, %v204_v48  ;;  %v203_v49 = vadd.f32 %v199_v15, %v2012_v29 }
  0xf6   :  { %1548 = vmatprep.subr.bf16.mxu1 %v208_v51 }
  0xf7   :  { %1549 = vmatpush3.bf16.msra.mxu1 %v208_v51 }
  0xf8   :  { %1550 = vmatprep.subr.bf16.mxu1 %v209_v6 }
  0xfb   :  { %1551 = vmatpush3.bf16.msra.mxu1 %v209_v6  ;;  %v201_v6 = vadd.f32 %v197_v16, %v1948_v55 }
  0xfe   :  { %1553 = vmatmul.mubr.msk.bf16.vlgmr.msra.gmra.mrb[0].mxu1 %vm117_vm0, %v2057_v11 }
  0xff   :  { %1568 = vmatprep.mubr.msk.bf16.mxu1 %vm117_vm0, %v1886_v23 }
 0x1d1   :  { %v1554_v19 = vpop.f32.mrb[0].mxu1 }
 0x1d2   :  { %v250_v48 = vpop.f32.mrb[1].mxu1  ;;  %v259_v50 = vadd.f32 %v1554_v19, %v202_v18 }
 0x1d3   :  { %v251_v51 = vadd.f32 %v250_v48, %v200_v21  ;;  %v1555_v4 = vpop.f32.mrb[2].mxu1 }
 0x1d4   :  { %v262_v63 = vadd.f32 %v1555_v4, %v203_v49  ;;  %v253_v7 = vpop.f32.mrb[3].mxu1  ;;  %v267_v3 = vmax.f32 %v259_v50, 0.0 }
 0x1d5   :  { %v265_v35 = vmax.f32 %v251_v51, 0.0  ;;  %v254_v10 = vadd.f32 %v253_v7, %v201_v6 }
 0x1d6   :  { %v268_v9 = vmax.f32 %v262_v63, 0.0  ;;  %v2080_v13 = vmul.f32 %v267_v3, %v187_v45 }
 0x1d7   :  { %v266_v39 = vmax.f32 %v254_v10, 0.0  ;;  %v2074_v12 = vmul.f32 %v265_v35, %v185_v20 }
 0x1d8   :  { %v2076_v17 = vmul.f32 %v268_v9, %v188_v44 }
 0x1d9   :  { %v2078_v47 = vmul.f32 %v266_v39, %v186_v46 }
 0x1da   :  { %v278_v55 = vpack.c.bf16 %v2076_v17, %v2080_v13 }
 0x1db   :  { %v277_v29 = vpack.c.bf16 %v2078_v47, %v2074_v12 }
 0x1dd   :  { %1556 = vmatprep.subr.bf16.mxu0 %v277_v29 }
 0x1de   :  { %1557 = vmatpush3.bf16.msra.mxu0 %v277_v29 }
 0x1df   :  { %1558 = vmatprep.subr.bf16.mxu0 %v278_v55 }
 0x1e2   :  { %1559 = vmatpush3.bf16.msra.mxu0 %v278_v55 }
 0x1e5   :  { %1561 = vmatmul.mubr.msk.bf16.vlgmr.msra.gmra.mrb[4].mxu0 %vm117_vm0, %v1839_v8 }
 0x1e6   :  { %1576 = vmatprep.mubr.msk.bf16.mxu0 %vm117_vm0, %v1831_v5 }
 0x2b8   :  { %v1562_v20 = vpop.f32.mrb[4].mxu0 }
 0x2b9   :  { %v322_v3 = vadd.f32 %v1562_v20, %v1892_v25  ;;  %v313_v44 = vpop.f32.mrb[5].mxu0 }
 0x2ba   :  { %v314_v45 = vadd.f32 %v313_v44, %v1890_v24  ;;  %v1563_v46 = vpop.f32.mrb[6].mxu0 }
 0x2bb   :  { %v330_v14 = vmul.f32 0.5, %v322_v3  ;;  %v325_v15 = vadd.f32 %v1563_v46, %v1899_v28  ;;  %v316_v16 = vpop.f32.mrb[7].mxu0 }
 0x2bc   :  { %v328_v18 = vmul.f32 0.5, %v314_v45  ;;  %v317_v19 = vadd.f32 %v316_v16, %v1894_v26 }
 0x2bd   :  { %1690 = vtanh.f32 %v330_v14  ;;  %v331_v21 = vmul.f32 0.5, %v325_v15 }
 0x2be   :  { %1692 = vtanh.f32 %v328_v18  ;;  %v329_v48 = vmul.f32 0.5, %v317_v19 }
 0x2bf   :  { %1694 = vtanh.f32 %v331_v21 }
 0x2c0   :  { %1696 = vtanh.f32 %v329_v48 }
 0x2c7   :  { %v1691_v49 = vpop.eup %1690 }
 0x2c8   :  { %v1693_v50 = vpop.eup %1692  ;;  %v338_v4 = vmul.f32 0.5, %v1691_v49 }
 0x2c9   :  { %v1695_v51 = vpop.eup %1694  ;;  %v336_v6 = vmul.f32 0.5, %v1693_v50 }
 0x2ca   :  { %v1697_v63 = vpop.eup %1696  ;;  %v339_v7 = vmul.f32 0.5, %v1695_v51  ;;  %v342_v39 = vadd.f32 0.5, %v338_v4 }
 0x2cb   :  { %v340_v35 = vadd.f32 0.5, %v336_v6  ;;  %v337_v10 = vmul.f32 0.5, %v1697_v63 }
 0x2cc   :  { %v343_v9 = vadd.f32 0.5, %v339_v7  ;;  %v362_v45 = vmul.f32 %v342_v39, %v2080_v13 }
 0x2cd   :  { %v341_v29 = vadd.f32 0.5, %v337_v10  ;;  %v360_v55 = vmul.f32 %v340_v35, %v2074_v12 }
 0x2ce   :  { %v363_v3 = vmul.f32 %v343_v9, %v2076_v17 }
 0x2cf   :  { %v361_v20 = vmul.f32 %v341_v29, %v2078_v47 }
 0x2d0   :  { %v365_v46 = vpack.c.bf16 %v363_v3, %v362_v45 }
 0x2d1   :  { %v364_v44 = vpack.c.bf16 %v361_v20, %v360_v55 }
 0x2d3   :  { %1564 = vmatprep.subr.bf16.mxu1 %v364_v44 }
 0x2d4   :  { %1565 = vmatpush3.bf16.msra.mxu1 %v364_v44 }
 0x2d5   :  { %1566 = vmatprep.subr.bf16.mxu1 %v365_v46 }
 0x2d8   :  { %1567 = vmatpush3.bf16.msra.mxu1 %v365_v46 }
 0x2db   :  { %1569 = vmatmul.mubr.msk.bf16.vlgmr.msra.gmra.mrb[4].mxu1 %vm117_vm0, %v2057_v11 }
 0x2dc   :  { %1584 = vmatprep.mubr.msk.bf16.mxu1 %vm117_vm0, %v1886_v23 }
 0x3ae   :  { %v1570_v14 = vpop.f32.mrb[4].mxu1 }
 0x3af   :  { %v409_v15 = vadd.f32 %v1570_v14, %v2004_v22  ;;  %v400_v16 = vpop.f32.mrb[5].mxu1 }
 0x3b0   :  { %v401_v18 = vadd.f32 %v400_v16, %v1940_v52  ;;  %v1571_v19 = vpop.f32.mrb[6].mxu1 }
 0x3b1   :  { %v417_v21 = vmax.f32 %v409_v15, 0.0  ;;  %v412_v48 = vadd.f32 %v1571_v19, %v2027_v34  ;;  %v403_v49 = vpop.f32.mrb[7].mxu1 }
 0x3b2   :  { %v415_v50 = vmax.f32 %v401_v18, 0.0  ;;  %v404_v51 = vadd.f32 %v403_v49, %v1963_v60 }
 0x3b3   :  { %v418_v4 = vmax.f32 %v412_v48, 0.0  ;;  %v421_v6 = vsub.f32 %v417_v21, %v2080_v13 }
 0x3b4   :  { %v419_v63 = vsub.f32 %v415_v50, %v2074_v12  ;;  %v416_v7 = vmax.f32 %v404_v51, 0.0 }
 0x3b5   :  { %v422_v10 = vsub.f32 %v418_v4, %v2076_v17  ;;  %v425_v20 = vmul.f32 %v421_v6, %v342_v39 }
 0x3b6   :  { %v423_v22 = vmul.f32 %v419_v63, %v340_v35  ;;  %v420_v55 = vsub.f32 %v416_v7, %v2078_v47 }
 0x3b7   :  { %v426_v52 = vmul.f32 %v422_v10, %v343_v9  ;;  %v2120_v45 = vadd.f32 %v425_v20, %v2080_v13 }
 0x3b8   :  { %v424_v3 = vmul.f32 %v420_v55, %v341_v29  ;;  %v2111_v34 = vadd.f32 %v423_v22, %v2074_v12 }
 0x3b9   :  { %v2114_v44 = vadd.f32 %v426_v52, %v2076_v17 }
 0x3ba   :  { %v2117_v60 = vadd.f32 %v424_v3, %v2078_v47 }
 0x3bb   :  { %v432_v9 = vpack.c.bf16 %v2114_v44, %v2120_v45 }
 0x3bc   :  { %v431_v35 = vpack.c.bf16 %v2117_v60, %v2111_v34 }
 0x3be   :  { %1572 = vmatprep.subr.bf16.mxu0 %v431_v35 }
 0x3bf   :  { %1573 = vmatpush3.bf16.msra.mxu0 %v431_v35 }
 0x3c0   :  { %1574 = vmatprep.subr.bf16.mxu0 %v432_v9 }
 0x3c3   :  { %1575 = vmatpush3.bf16.msra.mxu0 %v432_v9 }
 0x3c6   :  { %1577 = vmatmul.mubr.msk.bf16.vlgmr.msra.gmra.mrb[8].mxu0 %vm117_vm0, %v1839_v8 }
 0x3c7   :  { %1592 = vmatprep.mubr.msk.bf16.mxu0 %vm117_vm0, %v1831_v5 }
 0x499   :  { %v1578_v12 = vpop.f32.mrb[8].mxu0 }
 0x49a   :  { %v476_v17 = vadd.f32 %v1578_v12, %v1892_v25  ;;  %v467_v47 = vpop.f32.mrb[9].mxu0 }
 0x49b   :  { %v468_v13 = vadd.f32 %v467_v47, %v1890_v24  ;;  %v1579_v39 = vpop.f32.mrb[10].mxu0 }
 0x49c   :  { %v484_v29 = vmul.f32 0.5, %v476_v17  ;;  %v479_v46 = vadd.f32 %v1579_v39, %v1899_v28  ;;  %v470_v14 = vpop.f32.mrb[11].mxu0 }
 0x49d   :  { %v482_v15 = vmul.f32 0.5, %v468_v13  ;;  %v471_v16 = vadd.f32 %v470_v14, %v1894_v26 }
 0x49e   :  { %1698 = vtanh.f32 %v484_v29  ;;  %v485_v18 = vmul.f32 0.5, %v479_v46 }
 0x49f   :  { %1700 = vtanh.f32 %v482_v15  ;;  %v483_v19 = vmul.f32 0.5, %v471_v16 }
 0x4a0   :  { %1702 = vtanh.f32 %v485_v18 }
 0x4a1   :  { %1704 = vtanh.f32 %v483_v19 }
 0x4a8   :  { %v1699_v21 = vpop.eup %1698 }
 0x4a9   :  { %v1701_v48 = vpop.eup %1700  ;;  %v492_v50 = vmul.f32 0.5, %v1699_v21 }
 0x4aa   :  { %v1703_v49 = vpop.eup %1702  ;;  %v490_v51 = vmul.f32 0.5, %v1701_v48 }
 0x4ab   :  { %v1705_v4 = vpop.eup %1704  ;;  %v493_v6 = vmul.f32 0.5, %v1703_v49  ;;  %v496_v22 = vadd.f32 0.5, %v492_v50 }
 0x4ac   :  { %v494_v63 = vadd.f32 0.5, %v490_v51  ;;  %v491_v7 = vmul.f32 0.5, %v1705_v4 }
 0x4ad   :  { %v497_v10 = vadd.f32 0.5, %v493_v6  ;;  %v516_v9 = vmul.f32 %v496_v22, %v2120_v45 }
 0x4ae   :  { %v495_v55 = vadd.f32 0.5, %v491_v7  ;;  %v514_v52 = vmul.f32 %v494_v63, %v2111_v34 }
 0x4af   :  { %v517_v3 = vmul.f32 %v497_v10, %v2114_v44 }
 0x4b0   :  { %v515_v20 = vmul.f32 %v495_v55, %v2117_v60 }
 0x4b1   :  { %v519_v12 = vpack.c.bf16 %v517_v3, %v516_v9 }
 0x4b2   :  { %v518_v35 = vpack.c.bf16 %v515_v20, %v514_v52 }
 0x4b4   :  { %1580 = vmatprep.subr.bf16.mxu1 %v518_v35 }
 0x4b5   :  { %1581 = vmatpush3.bf16.msra.mxu1 %v518_v35 }
 0x4b6   :  { %1582 = vmatprep.subr.bf16.mxu1 %v519_v12 }
 0x4b9   :  { %1583 = vmatpush3.bf16.msra.mxu1 %v519_v12 }
 0x4bc   :  { %1585 = vmatmul.mubr.msk.bf16.vlgmr.msra.gmra.mrb[8].mxu1 %vm117_vm0, %v2057_v11 }
 0x4bd   :  { %1600 = vmatprep.mubr.msk.bf16.mxu1 %vm117_vm0, %v1886_v23 }
 0x58f   :  { %v1586_v17 = vpop.f32.mrb[8].mxu1 }
 0x590   :  { %v563_v47 = vadd.f32 %v1586_v17, %v2007_v36  ;;  %v554_v13 = vpop.f32.mrb[9].mxu1 }
 0x591   :  { %v555_v39 = vadd.f32 %v554_v13, %v1943_v53  ;;  %v1587_v29 = vpop.f32.mrb[10].mxu1 }
 0x592   :  { %v571_v46 = vmax.f32 %v563_v47, 0.0  ;;  %v566_v14 = vadd.f32 %v1587_v29, %v2030_v37  ;;  %v557_v15 = vpop.f32.mrb[11].mxu1 }
 0x593   :  { %v569_v16 = vmax.f32 %v555_v39, 0.0  ;;  %v558_v18 = vadd.f32 %v557_v15, %v1966_v61 }
 0x594   :  { %v572_v19 = vmax.f32 %v566_v14, 0.0  ;;  %v575_v21 = vsub.f32 %v571_v46, %v2120_v45 }
 0x595   :  { %v573_v48 = vsub.f32 %v569_v16, %v2111_v34  ;;  %v570_v49 = vmax.f32 %v558_v18, 0.0 }
 0x596   :  { %v576_v50 = vsub.f32 %v572_v19, %v2114_v44  ;;  %v579_v4 = vmul.f32 %v575_v21, %v496_v22 }
 0x597   :  { %v577_v36 = vmul.f32 %v573_v48, %v494_v63  ;;  %v574_v51 = vsub.f32 %v570_v49, %v2117_v60 }
 0x598   :  { %v580_v53 = vmul.f32 %v576_v50, %v497_v10  ;;  %v2160_v52 = vadd.f32 %v579_v4, %v2120_v45 }
 0x599   :  { %v578_v6 = vmul.f32 %v574_v51, %v495_v55  ;;  %v2151_v37 = vadd.f32 %v577_v36, %v2111_v34 }
 0x59a   :  { %v2154_v7 = vadd.f32 %v580_v53, %v2114_v44 }
 0x59b   :  { %v2157_v61 = vadd.f32 %v578_v6, %v2117_v60 }
 0x59c   :  { %v586_v10 = vpack.c.bf16 %v2154_v7, %v2160_v52 }
 0x59d   :  { %v585_v63 = vpack.c.bf16 %v2157_v61, %v2151_v37 }
 0x59f   :  { %1588 = vmatprep.subr.bf16.mxu0 %v585_v63 }
 0x5a0   :  { %1589 = vmatpush3.bf16.msra.mxu0 %v585_v63 }
 0x5a1   :  { %1590 = vmatprep.subr.bf16.mxu0 %v586_v10 }
 0x5a4   :  { %1591 = vmatpush3.bf16.msra.mxu0 %v586_v10 }
 0x5a7   :  { %1593 = vmatmul.mubr.msk.bf16.vlgmr.msra.gmra.mrb[12].mxu0 %vm117_vm0, %v1839_v8 }
 0x5a8   :  { %1608 = vmatprep.mubr.msk.bf16.mxu0 %vm117_vm0, %v1831_v5 }
 0x67a   :  { %v1594_v34 = vpop.f32.mrb[12].mxu0 }
 0x67b   :  { %v630_v44 = vadd.f32 %v1594_v34, %v1892_v25  ;;  %v621_v60 = vpop.f32.mrb[13].mxu0 }
 0x67c   :  { %v622_v45 = vadd.f32 %v621_v60, %v1890_v24  ;;  %v1595_v22 = vpop.f32.mrb[14].mxu0 }
 0x67d   :  { %v638_v55 = vmul.f32 0.5, %v630_v44  ;;  %v633_v20 = vadd.f32 %v1595_v22, %v1899_v28  ;;  %v624_v3 = vpop.f32.mrb[15].mxu0 }
 0x67e   :  { %v636_v35 = vmul.f32 0.5, %v622_v45  ;;  %v625_v9 = vadd.f32 %v624_v3, %v1894_v26 }
 0x67f   :  { %1706 = vtanh.f32 %v638_v55  ;;  %v639_v12 = vmul.f32 0.5, %v633_v20 }
 0x680   :  { %1708 = vtanh.f32 %v636_v35  ;;  %v637_v17 = vmul.f32 0.5, %v625_v9 }
 0x681   :  { %1710 = vtanh.f32 %v639_v12 }
 0x682   :  { %1712 = vtanh.f32 %v637_v17 }
 0x689   :  { %v1707_v47 = vpop.eup %1706 }
 0x68a   :  { %v1709_v13 = vpop.eup %1708  ;;  %v646_v29 = vmul.f32 0.5, %v1707_v47 }
 0x68b   :  { %v1711_v39 = vpop.eup %1710  ;;  %v644_v46 = vmul.f32 0.5, %v1709_v13 }
 0x68c   :  { %v1713_v14 = vpop.eup %1712  ;;  %v647_v15 = vmul.f32 0.5, %v1711_v39  ;;  %v650_v21 = vadd.f32 0.5, %v646_v29 }
 0x68d   :  { %v648_v16 = vadd.f32 0.5, %v644_v46  ;;  %v645_v18 = vmul.f32 0.5, %v1713_v14 }
 0x68e   :  { %v651_v19 = vadd.f32 0.5, %v647_v15  ;;  %v670_v53 = vmul.f32 %v650_v21, %v2160_v52 }
 0x68f   :  { %v649_v48 = vadd.f32 0.5, %v645_v18  ;;  %v668_v49 = vmul.f32 %v648_v16, %v2151_v37 }
 0x690   :  { %v671_v36 = vmul.f32 %v651_v19, %v2154_v7 }
 0x691   :  { %v669_v50 = vmul.f32 %v649_v48, %v2157_v61 }
 0x692   :  { %v673_v4 = vpack.c.bf16 %v671_v36, %v670_v53 }
 0x693   :  { %v672_v51 = vpack.c.bf16 %v669_v50, %v668_v49 }
 0x695   :  { %1596 = vmatprep.subr.bf16.mxu1 %v672_v51 }
 0x696   :  { %1597 = vmatpush3.bf16.msra.mxu1 %v672_v51 }
 0x697   :  { %1598 = vmatprep.subr.bf16.mxu1 %v673_v4 }
 0x69a   :  { %1599 = vmatpush3.bf16.msra.mxu1 %v673_v4 }
 0x69d   :  { %1601 = vmatmul.mubr.msk.bf16.vlgmr.msra.gmra.mrb[12].mxu1 %vm117_vm0, %v2057_v11 }
 0x69e   :  { %1616 = vmatprep.mubr.msk.bf16.mxu1 %vm117_vm0, %v1886_v23 }
 0x770   :  { %v1602_v6 = vpop.f32.mrb[12].mxu1 }
 0x771   :  { %v717_v63 = vadd.f32 %v1602_v6, %v2010_v27  ;;  %v708_v10 = vpop.f32.mrb[13].mxu1 }
 0x772   :  { %v709_v34 = vadd.f32 %v708_v10, %v1946_v54  ;;  %v1603_v44 = vpop.f32.mrb[14].mxu1 }
 0x773   :  { %v725_v60 = vmax.f32 %v717_v63, 0.0  ;;  %v720_v45 = vadd.f32 %v1603_v44, %v2033_v38  ;;  %v711_v22 = vpop.f32.mrb[15].mxu1 }
 0x774   :  { %v723_v55 = vmax.f32 %v709_v34, 0.0  ;;  %v712_v20 = vadd.f32 %v711_v22, %v1969_v62 }
 0x775   :  { %v726_v3 = vmax.f32 %v720_v45, 0.0  ;;  %v729_v35 = vsub.f32 %v725_v60, %v2160_v52 }
 0x776   :  { %v727_v9 = vsub.f32 %v723_v55, %v2151_v37  ;;  %v724_v12 = vmax.f32 %v712_v20, 0.0 }
 0x777   :  { %v730_v17 = vsub.f32 %v726_v3, %v2154_v7  ;;  %v733_v13 = vmul.f32 %v729_v35, %v650_v21 }
 0x778   :  { %v731_v27 = vmul.f32 %v727_v9, %v648_v16  ;;  %v728_v47 = vsub.f32 %v724_v12, %v2157_v61 }
 0x779   :  { %v734_v54 = vmul.f32 %v730_v17, %v651_v19  ;;  %v2200_v46 = vadd.f32 %v733_v13, %v2160_v52 }
 0x77a   :  { %v732_v39 = vmul.f32 %v728_v47, %v649_v48  ;;  %v2191_v38 = vadd.f32 %v731_v27, %v2151_v37 }
 0x77b   :  { %v2194_v29 = vadd.f32 %v734_v54, %v2154_v7 }
 0x77c   :  { %v2197_v62 = vadd.f32 %v732_v39, %v2157_v61 }
 0x77d   :  { %v740_v15 = vpack.c.bf16 %v2194_v29, %v2200_v46 }
 0x77e   :  { %v739_v14 = vpack.c.bf16 %v2197_v62, %v2191_v38 }
 0x780   :  { %1604 = vmatprep.subr.bf16.mxu0 %v739_v14 }
 0x781   :  { %1605 = vmatpush3.bf16.msra.mxu0 %v739_v14 }
 0x782   :  { %1606 = vmatprep.subr.bf16.mxu0 %v740_v15 }
 0x785   :  { %1607 = vmatpush3.bf16.msra.mxu0 %v740_v15 }
 0x788   :  { %1609 = vmatmul.mubr.msk.bf16.vlgmr.msra.gmra.mrb[16].mxu0 %vm117_vm0, %v1839_v8 }
 0x789   :  { %1624 = vmatprep.mubr.msk.bf16.mxu0 %vm117_vm0, %v1831_v5 }
 0x85b   :  { %v1610_v37 = vpop.f32.mrb[16].mxu0 }
 0x85c   :  { %v784_v7 = vadd.f32 %v1610_v37, %v1892_v25  ;;  %v775_v61 = vpop.f32.mrb[17].mxu0 }
 0x85d   :  { %v776_v52 = vadd.f32 %v775_v61, %v1890_v24  ;;  %v1611_v16 = vpop.f32.mrb[18].mxu0 }
 0x85e   :  { %v792_v18 = vmul.f32 0.5, %v784_v7  ;;  %v787_v19 = vadd.f32 %v1611_v16, %v1899_v28  ;;  %v778_v21 = vpop.f32.mrb[19].mxu0 }
 0x85f   :  { %v790_v48 = vmul.f32 0.5, %v776_v52  ;;  %v779_v49 = vadd.f32 %v778_v21, %v1894_v26 }
 0x860   :  { %1714 = vtanh.f32 %v792_v18  ;;  %v793_v50 = vmul.f32 0.5, %v787_v19 }
 0x861   :  { %1716 = vtanh.f32 %v790_v48  ;;  %v791_v36 = vmul.f32 0.5, %v779_v49 }
 0x862   :  { %1718 = vtanh.f32 %v793_v50 }
 0x863   :  { %1720 = vtanh.f32 %v791_v36 }
 0x86a   :  { %v1715_v51 = vpop.eup %1714 }
 0x86b   :  { %v1717_v53 = vpop.eup %1716  ;;  %v800_v6 = vmul.f32 0.5, %v1715_v51 }
 0x86c   :  { %v1719_v4 = vpop.eup %1718  ;;  %v798_v63 = vmul.f32 0.5, %v1717_v53 }
 0x86d   :  { %v1721_v10 = vpop.eup %1720  ;;  %v801_v34 = vmul.f32 0.5, %v1719_v4  ;;  %v804_v22 = vadd.f32 0.5, %v800_v6 }
 0x86e   :  { %v802_v44 = vadd.f32 0.5, %v798_v63  ;;  %v799_v60 = vmul.f32 0.5, %v1721_v10 }
 0x86f   :  { %v805_v45 = vadd.f32 0.5, %v801_v34  ;;  %v824_v12 = vmul.f32 %v804_v22, %v2200_v46 }
 0x870   :  { %v803_v55 = vadd.f32 0.5, %v799_v60  ;;  %v822_v20 = vmul.f32 %v802_v44, %v2191_v38 }
 0x871   :  { %v825_v35 = vmul.f32 %v805_v45, %v2194_v29 }
 0x872   :  { %v823_v3 = vmul.f32 %v803_v55, %v2197_v62 }
 0x873   :  { %v827_v17 = vpack.c.bf16 %v825_v35, %v824_v12 }
 0x874   :  { %v826_v9 = vpack.c.bf16 %v823_v3, %v822_v20 }
 0x876   :  { %1612 = vmatprep.subr.bf16.mxu1 %v826_v9 }
 0x877   :  { %1613 = vmatpush3.bf16.msra.mxu1 %v826_v9 }
 0x878   :  { %1614 = vmatprep.subr.bf16.mxu1 %v827_v17 }
 0x87b   :  { %1615 = vmatpush3.bf16.msra.mxu1 %v827_v17 }
 0x87e   :  { %1617 = vmatmul.mubr.msk.bf16.vlgmr.msra.gmra.mrb[16].mxu1 %vm117_vm0, %v2057_v11 }
 0x87f   :  { %1632 = vmatprep.mubr.msk.bf16.mxu1 %vm117_vm0, %v1886_v23 }
 0x951   :  { %v1618_v27 = vpop.f32.mrb[16].mxu1 }
 0x952   :  { %v871_v47 = vadd.f32 %v1618_v27, %v2015_v30  ;;  %v862_v54 = vpop.f32.mrb[17].mxu1 }
 0x953   :  { %v863_v13 = vadd.f32 %v862_v54, %v1951_v56  ;;  %v1619_v39 = vpop.f32.mrb[18].mxu1 }
 0x954   :  { %v879_v14 = vmax.f32 %v871_v47, 0.0  ;;  %v874_v15 = vadd.f32 %v1619_v39, %v2036_v40  ;;  %v865_v37 = vpop.f32.mrb[19].mxu1 }
 0x955   :  { %v877_v7 = vmax.f32 %v863_v13, 0.0  ;;  %v866_v61 = vadd.f32 %v865_v37, %v1974_v0 }
 0x956   :  { %v880_v52 = vmax.f32 %v874_v15, 0.0  ;;  %v883_v16 = vsub.f32 %v879_v14, %v2200_v46 }
 0x957   :  { %v881_v18 = vsub.f32 %v877_v7, %v2191_v38  ;;  %v878_v19 = vmax.f32 %v866_v61, 0.0 }
 0x958   :  { %v884_v21 = vsub.f32 %v880_v52, %v2194_v29  ;;  %v887_v49 = vmul.f32 %v883_v16, %v804_v22 }
 0x959   :  { %v885_v30 = vmul.f32 %v881_v18, %v802_v44  ;;  %v882_v48 = vsub.f32 %v878_v19, %v2197_v62 }
 0x95a   :  { %v888_v56 = vmul.f32 %v884_v21, %v805_v45  ;;  %v2240_v51 = vadd.f32 %v887_v49, %v2200_v46 }
 0x95b   :  { %v886_v50 = vmul.f32 %v882_v48, %v803_v55  ;;  %v2231_v40 = vadd.f32 %v885_v30, %v2191_v38 }
 0x95c   :  { %v2234_v36 = vadd.f32 %v888_v56, %v2194_v29 }
 0x95d   :  { %v2237_v0 = vadd.f32 %v886_v50, %v2197_v62 }
 0x95e   :  { %v894_v4 = vpack.c.bf16 %v2234_v36, %v2240_v51 }
 0x95f   :  { %v893_v53 = vpack.c.bf16 %v2237_v0, %v2231_v40 }
 0x961   :  { %1620 = vmatprep.subr.bf16.mxu0 %v893_v53 }
 0x962   :  { %1621 = vmatpush3.bf16.msra.mxu0 %v893_v53 }
 0x963   :  { %1622 = vmatprep.subr.bf16.mxu0 %v894_v4 }
 0x966   :  { %1623 = vmatpush3.bf16.msra.mxu0 %v894_v4 }
 0x969   :  { %1625 = vmatmul.mubr.msk.bf16.vlgmr.msra.gmra.mrb[20].mxu0 %vm117_vm0, %v1839_v8 }
 0x96a   :  { %1640 = vmatprep.mubr.msk.bf16.mxu0 %vm117_vm0, %v1831_v5 }
 0xa3c   :  { %v1626_v38 = vpop.f32.mrb[20].mxu0 }
 0xa3d   :  { %v938_v29 = vadd.f32 %v1626_v38, %v1892_v25  ;;  %v929_v62 = vpop.f32.mrb[21].mxu0 }
 0xa3e   :  { %v930_v46 = vadd.f32 %v929_v62, %v1890_v24  ;;  %v1627_v6 = vpop.f32.mrb[22].mxu0 }
 0xa3f   :  { %v946_v63 = vmul.f32 0.5, %v938_v29  ;;  %v941_v10 = vadd.f32 %v1627_v6, %v1899_v28  ;;  %v932_v34 = vpop.f32.mrb[23].mxu0 }
 0xa40   :  { %v944_v44 = vmul.f32 0.5, %v930_v46  ;;  %v933_v60 = vadd.f32 %v932_v34, %v1894_v26 }
 0xa41   :  { %1722 = vtanh.f32 %v946_v63  ;;  %v947_v45 = vmul.f32 0.5, %v941_v10 }
 0xa42   :  { %1724 = vtanh.f32 %v944_v44  ;;  %v945_v22 = vmul.f32 0.5, %v933_v60 }
 0xa43   :  { %1726 = vtanh.f32 %v947_v45 }
 0xa44   :  { %1728 = vtanh.f32 %v945_v22 }
 0xa4b   :  { %v1723_v55 = vpop.eup %1722 }
 0xa4c   :  { %v1725_v20 = vpop.eup %1724  ;;  %v954_v35 = vmul.f32 0.5, %v1723_v55 }
 0xa4d   :  { %v1727_v3 = vpop.eup %1726  ;;  %v952_v9 = vmul.f32 0.5, %v1725_v20 }
 0xa4e   :  { %v1729_v12 = vpop.eup %1728  ;;  %v955_v17 = vmul.f32 0.5, %v1727_v3  ;;  %v958_v13 = vadd.f32 0.5, %v954_v35 }
 0xa4f   :  { %v956_v27 = vadd.f32 0.5, %v952_v9  ;;  %v953_v47 = vmul.f32 0.5, %v1729_v12 }
 0xa50   :  { %v959_v54 = vadd.f32 0.5, %v955_v17  ;;  %v978_v61 = vmul.f32 %v958_v13, %v2240_v51 }
 0xa51   :  { %v957_v39 = vadd.f32 0.5, %v953_v47  ;;  %v976_v14 = vmul.f32 %v956_v27, %v2231_v40 }
 0xa52   :  { %v979_v37 = vmul.f32 %v959_v54, %v2234_v36 }
 0xa53   :  { %v977_v15 = vmul.f32 %v957_v39, %v2237_v0 }
 0xa54   :  { %v981_v52 = vpack.c.bf16 %v979_v37, %v978_v61 }
 0xa55   :  { %v980_v7 = vpack.c.bf16 %v977_v15, %v976_v14 }
 0xa57   :  { %1628 = vmatprep.subr.bf16.mxu1 %v980_v7 }
 0xa58   :  { %1629 = vmatpush3.bf16.msra.mxu1 %v980_v7 }
 0xa59   :  { %1630 = vmatprep.subr.bf16.mxu1 %v981_v52 }
 0xa5c   :  { %1631 = vmatpush3.bf16.msra.mxu1 %v981_v52 }
 0xa5f   :  { %1633 = vmatmul.mubr.msk.bf16.vlgmr.msra.gmra.mrb[20].mxu1 %vm117_vm0, %v2057_v11 }
 0xa60   :  { %1648 = vmatprep.mubr.msk.bf16.mxu1 %vm117_vm0, %v1886_v23 }
 0xb32   :  { %v1634_v16 = vpop.f32.mrb[20].mxu1 }
 0xb33   :  { %v1025_v18 = vadd.f32 %v1634_v16, %v2018_v31  ;;  %v1016_v19 = vpop.f32.mrb[21].mxu1 }
 0xb34   :  { %v1017_v21 = vadd.f32 %v1016_v19, %v1954_v57  ;;  %v1635_v30 = vpop.f32.mrb[22].mxu1 }
 0xb35   :  { %v1033_v48 = vmax.f32 %v1025_v18, 0.0  ;;  %v1028_v56 = vadd.f32 %v1635_v30, %v2039_v41  ;;  %v1019_v49 = vpop.f32.mrb[23].mxu1 }
 0xb36   :  { %v1031_v50 = vmax.f32 %v1017_v21, 0.0  ;;  %v1020_v53 = vadd.f32 %v1019_v49, %v1977_v1 }
 0xb37   :  { %v1034_v4 = vmax.f32 %v1028_v56, 0.0  ;;  %v1037_v38 = vsub.f32 %v1033_v48, %v2240_v51 }
 0xb38   :  { %v1035_v29 = vsub.f32 %v1031_v50, %v2231_v40  ;;  %v1032_v62 = vmax.f32 %v1020_v53, 0.0 }
 0xb39   :  { %v1038_v46 = vsub.f32 %v1034_v4, %v2234_v36  ;;  %v1041_v63 = vmul.f32 %v1037_v38, %v958_v13 }
 0xb3a   :  { %v1039_v31 = vmul.f32 %v1035_v29, %v956_v27  ;;  %v1036_v6 = vsub.f32 %v1032_v62, %v2237_v0 }
 0xb3b   :  { %v1042_v57 = vmul.f32 %v1038_v46, %v959_v54  ;;  %v2280_v44 = vadd.f32 %v1041_v63, %v2240_v51 }
 0xb3c   :  { %v1040_v10 = vmul.f32 %v1036_v6, %v957_v39  ;;  %v2271_v41 = vadd.f32 %v1039_v31, %v2231_v40 }
 0xb3d   :  { %v2274_v34 = vadd.f32 %v1042_v57, %v2234_v36 }
 0xb3e   :  { %v2277_v1 = vadd.f32 %v1040_v10, %v2237_v0 }
 0xb3f   :  { %v1048_v45 = vpack.c.bf16 %v2274_v34, %v2280_v44 }
 0xb40   :  { %v1047_v60 = vpack.c.bf16 %v2277_v1, %v2271_v41 }
 0xb42   :  { %1636 = vmatprep.subr.bf16.mxu0 %v1047_v60 }
 0xb43   :  { %1637 = vmatpush3.bf16.msra.mxu0 %v1047_v60 }
 0xb44   :  { %1638 = vmatprep.subr.bf16.mxu0 %v1048_v45 }
 0xb47   :  { %1639 = vmatpush3.bf16.msra.mxu0 %v1048_v45 }
 0xb4a   :  { %1641 = vmatmul.mubr.msk.bf16.vlgmr.msra.gmra.mrb[24].mxu0 %vm117_vm0, %v1839_v8 }
 0xb4b   :  { %1656 = vmatprep.mubr.msk.bf16.mxu0 %vm117_vm0, %v1831_v5 }
 0xc1d   :  { %v1642_v40 = vpop.f32.mrb[24].mxu0 }
 0xc1e   :  { %v1092_v36 = vadd.f32 %v1642_v40, %v1892_v25  ;;  %v1083_v0 = vpop.f32.mrb[25].mxu0 }
 0xc1f   :  { %v1084_v51 = vadd.f32 %v1083_v0, %v1890_v24  ;;  %v1643_v22 = vpop.f32.mrb[26].mxu0 }
 0xc20   :  { %v1100_v55 = vmul.f32 0.5, %v1092_v36  ;;  %v1095_v20 = vadd.f32 %v1643_v22, %v1899_v28  ;;  %v1086_v3 = vpop.f32.mrb[27].mxu0 }
 0xc21   :  { %v1098_v35 = vmul.f32 0.5, %v1084_v51  ;;  %v1087_v9 = vadd.f32 %v1086_v3, %v1894_v26 }
 0xc22   :  { %1730 = vtanh.f32 %v1100_v55  ;;  %v1101_v12 = vmul.f32 0.5, %v1095_v20 }
 0xc23   :  { %1732 = vtanh.f32 %v1098_v35  ;;  %v1099_v17 = vmul.f32 0.5, %v1087_v9 }
 0xc24   :  { %1734 = vtanh.f32 %v1101_v12 }
 0xc25   :  { %1736 = vtanh.f32 %v1099_v17 }
 0xc2c   :  { %v1731_v5 = vpop.eup %1730 }
 0xc2d   :  { %v1733_v27 = vpop.eup %1732  ;;  %v1108_v54 = vmul.f32 0.5, %v1731_v5 }
 0xc2e   :  { %v1735_v47 = vpop.eup %1734  ;;  %v1106_v13 = vmul.f32 0.5, %v1733_v27 }
 0xc2f   :  { %v1737_v39 = vpop.eup %1736  ;;  %v1109_v14 = vmul.f32 0.5, %v1735_v47  ;;  %v1112_v61 = vadd.f32 0.5, %v1108_v54 }
 0xc30   :  { %v1110_v15 = vadd.f32 0.5, %v1106_v13  ;;  %v1107_v37 = vmul.f32 0.5, %v1737_v39 }
 0xc31   :  { %v1113_v7 = vadd.f32 0.5, %v1109_v14  ;;  %v1132_v30 = vmul.f32 %v1112_v61, %v2280_v44 }
 0xc32   :  { %v1111_v52 = vadd.f32 0.5, %v1107_v37  ;;  %v1130_v16 = vmul.f32 %v1110_v15, %v2271_v41 }
 0xc33   :  { %v1133_v19 = vmul.f32 %v1113_v7, %v2274_v34 }
 0xc34   :  { %v1131_v18 = vmul.f32 %v1111_v52, %v2277_v1 }
 0xc35   :  { %v1135_v48 = vpack.c.bf16 %v1133_v19, %v1132_v30  ;;  %v1771_v19 = vmov 0.0  }
 0xc36   :  { %v1134_v21 = vpack.c.bf16 %v1131_v18, %v1130_v16 }
 0xc38   :  { %1644 = vmatprep.subr.bf16.mxu1 %v1134_v21 }
 0xc39   :  { %1645 = vmatpush3.bf16.msra.mxu1 %v1134_v21 }
 0xc3a   :  { %1646 = vmatprep.subr.bf16.mxu1 %v1135_v48 }
 0xc3d   :  { %1647 = vmatpush3.bf16.msra.mxu1 %v1135_v48 }
 0xc40   :  { %1649 = vmatmul.mubr.msk.bf16.vlgmr.msra.gmra.mrb[24].mxu1 %vm117_vm0, %v2057_v11 }
 0xc41   :  { %1664 = vmatprep.mubr.msk.bf16.mxu1 %vm117_vm0, %v1886_v23 }
 0xd13   :  { %v1650_v56 = vpop.f32.mrb[24].mxu1 }
 0xd14   :  { %v1179_v49 = vadd.f32 %v1650_v56, %v2021_v32  ;;  %v1170_v50 = vpop.f32.mrb[25].mxu1 }
 0xd15   :  { %v1171_v53 = vadd.f32 %v1170_v50, %v1957_v58  ;;  %v1651_v4 = vpop.f32.mrb[26].mxu1 }
 0xd16   :  { %v1187_v38 = vmax.f32 %v1179_v49, 0.0  ;;  %v1182_v29 = vadd.f32 %v1651_v4, %v2042_v42  ;;  %v1173_v62 = vpop.f32.mrb[27].mxu1 }
 0xd17   :  { %v1185_v46 = vmax.f32 %v1171_v53, 0.0  ;;  %v1174_v31 = vadd.f32 %v1173_v62, %v1980_v2 }
 0xd18   :  { %v1188_v6 = vmax.f32 %v1182_v29, 0.0  ;;  %v1191_v57 = vsub.f32 %v1187_v38, %v2280_v44  ;;  %v2376_v29 = vld [vmem:[#allocation6_spill] sm:$0xff] }
 0xd19   :  { %v1189_v63 = vsub.f32 %v1185_v46, %v2271_v41  ;;  %v1186_v23 = vmax.f32 %v1174_v31, 0.0 }
 0xd1a   :  { %v1192_v10 = vsub.f32 %v1188_v6, %v2274_v34  ;;  %v1195_v45 = vmul.f32 %v1191_v57, %v1112_v61 }
 0xd1b   :  { %v1193_v32 = vmul.f32 %v1189_v63, %v1110_v15  ;;  %v1190_v60 = vsub.f32 %v1186_v23, %v2277_v1 }
 0xd1c   :  { %v1196_v58 = vmul.f32 %v1192_v10, %v1113_v7  ;;  %v2320_v0 = vadd.f32 %v1195_v45, %v2280_v44 }
 0xd1d   :  { %v1194_v40 = vmul.f32 %v1190_v60, %v1111_v52  ;;  %v2311_v42 = vadd.f32 %v1193_v32, %v2271_v41 }
 0xd1e   :  { %v2314_v36 = vadd.f32 %v1196_v58, %v2274_v34 }
 0xd1f   :  { %v2317_v2 = vadd.f32 %v1194_v40, %v2277_v1 }
 0xd20   :  { %v1202_v22 = vpack.c.bf16 %v2314_v36, %v2320_v0 }
 0xd21   :  { %v1201_v51 = vpack.c.bf16 %v2317_v2, %v2311_v42 }
 0xd23   :  { %1652 = vmatprep.subr.bf16.mxu0 %v1201_v51 }
 0xd24   :  { %1653 = vmatpush3.bf16.msra.mxu0 %v1201_v51  ;;  %v1355_v51 = vld [vmem:[%s2372_s6] sm:$0x1]  ;;  %s1746_s6 = scalar_lea.vmem %s1421_s12, 16 }
 0xd25   :  { %1654 = vmatprep.subr.bf16.mxu0 %v1202_v22  ;;  %p1747_p0 = scmp.ne.s32.totalorder %s1421_s12, %s1746_s6  ;;  %p1752_p2 = scmp.lt.s32.totalorder %s1750_s13, %s1746_s6 }
 0xd27   :  { %p1753_p3 = por %p1752_p2, %p1751_p1 }
 0xd28   :  { %1655 = vmatpush3.bf16.msra.mxu0 %v1202_v22  ;;  %v1356_v22 = vpack.c.bf16 %v1355_v51, %v1355_v51 }
 0xd29   :  { %1668 = vmatprep.subr.bf16.mxu0 %v1771_v19  ;;  %p1754_p4 = pnand %p1753_p3, %p1747_p0 }
 0xd2b   :  { %1657 = vmatmul.mubr.msk.bf16.vlgmr.msra.gmra.mrb[28].mxu0 %vm117_vm0, %v1839_v8 }
 0xd2c   :  { %1672 = vmatprep.mubr.msk.bf16.mxu0 %vm1772_vm1, %v1771_v19 }
 0xdfe   :  { %v1658_v41 = vpop.f32.mrb[28].mxu0 }
 0xdff   :  { %v1246_v34 = vadd.f32 %v1658_v41, %v1892_v25  ;;  %v1237_v1 = vpop.f32.mrb[29].mxu0  ;;  %v1365_v41 = vlaneseq }
 0xe00   :  { %v1238_v44 = vadd.f32 %v1237_v1, %v1890_v24  ;;  %v1659_v55 = vpop.f32.mrb[30].mxu0 }
 0xe01   :  { %v1254_v20 = vmul.f32 0.5, %v1246_v34  ;;  %v1249_v3 = vadd.f32 %v1659_v55, %v1899_v28  ;;  %v1240_v35 = vpop.f32.mrb[31].mxu0 }
 0xe02   :  { %v1252_v9 = vmul.f32 0.5, %v1238_v44  ;;  %v1241_v12 = vadd.f32 %v1240_v35, %v1894_v26 }
 0xe03   :  { %1738 = vtanh.f32 %v1254_v20  ;;  %v1255_v17 = vmul.f32 0.5, %v1249_v3 }
 0xe04   :  { %1740 = vtanh.f32 %v1252_v9  ;;  %v1253_v5 = vmul.f32 0.5, %v1241_v12 }
 0xe05   :  { %1742 = vtanh.f32 %v1255_v17 }
 0xe06   :  { %1744 = vtanh.f32 %v1253_v5 }
 0xe0d   :  { %v1739_v8 = vpop.eup %1738 }
 0xe0e   :  { %v1741_v27 = vpop.eup %1740  ;;  %v1262_v47 = vmul.f32 0.5, %v1739_v8 }
 0xe0f   :  { %v1743_v25 = vpop.eup %1742  ;;  %v1260_v54 = vmul.f32 0.5, %v1741_v27 }
 0xe10   :  { %v1745_v24 = vpop.eup %1744  ;;  %v1263_v13 = vmul.f32 0.5, %v1743_v25  ;;  %v1266_v15 = vadd.f32 0.5, %v1262_v47 }
 0xe11   :  { %v1264_v39 = vadd.f32 0.5, %v1260_v54  ;;  %v1261_v14 = vmul.f32 0.5, %v1745_v24 }
 0xe12   :  { %v1267_v28 = vadd.f32 0.5, %v1263_v13  ;;  %v1286_v16 = vmul.f32 %v1266_v15, %v2320_v0 }
 0xe13   :  { %v1265_v37 = vadd.f32 0.5, %v1261_v14  ;;  %v1284_v26 = vmul.f32 %v1264_v39, %v2311_v42 }
 0xe14   :  { %v1287_v61 = vmul.f32 %v1267_v28, %v2314_v36 }
 0xe15   :  { %v1285_v7 = vmul.f32 %v1265_v37, %v2317_v2 }
 0xe16   :  { %v1289_v18 = vpack.c.bf16 %v1287_v61, %v1286_v16 }
 0xe17   :  { %v1288_v52 = vpack.c.bf16 %v1285_v7, %v1284_v26 }
 0xe19   :  { %1660 = vmatprep.subr.bf16.mxu1 %v1288_v52 }
 0xe1a   :  { %1661 = vmatpush3.bf16.msra.mxu1 %v1288_v52 }
 0xe1b   :  { %1662 = vmatprep.subr.bf16.mxu1 %v1289_v18 }
 0xe1e   :  { %1663 = vmatpush3.bf16.msra.mxu1 %v1289_v18 }
 0xe21   :  { %1665 = vmatmul.mubr.msk.bf16.vlgmr.msra.gmra.mrb[28].mxu1 %vm117_vm0, %v2057_v11 }
 0xef4   :  { %v1666_v21 = vpop.f32.mrb[28].mxu1 }
 0xef5   :  { %v1333_v30 = vadd.f32 %v1666_v21, %v2024_v33  ;;  %v1324_v48 = vpop.f32.mrb[29].mxu1 }
 0xef6   :  { %v1325_v56 = vadd.f32 %v1324_v48, %v1960_v59  ;;  %v1667_v49 = vpop.f32.mrb[30].mxu1 }
 0xef7   :  { %v1341_v50 = vmax.f32 %v1333_v30, 0.0  ;;  %v1336_v53 = vadd.f32 %v1667_v49, %v2045_v43  ;;  %v1327_v4 = vpop.f32.mrb[31].mxu1 }
 0xef8   :  { %v1339_v38 = vmax.f32 %v1325_v56, 0.0  ;;  %v1328_v62 = vadd.f32 %v1327_v4, %v2376_v29 }
 0xef9   :  { %v1345_v11 = vsub.f32 %v1341_v50, %v2320_v0  ;;  %v1342_v46 = vmax.f32 %v1336_v53, 0.0 }
 0xefa   :  { %v1343_v31 = vsub.f32 %v1339_v38, %v2311_v42  ;;  %v1340_v6 = vmax.f32 %v1328_v62, 0.0 }
 0xefb   :  { %v1349_v57 = vmul.f32 %v1345_v11, %v1266_v15  ;;  %v1346_v33 = vsub.f32 %v1342_v46, %v2314_v36 }
 0xefc   :  { %v1347_v63 = vmul.f32 %v1343_v31, %v1264_v39  ;;  %v1344_v59 = vsub.f32 %v1340_v6, %v2317_v2 }
 0xefd   :  { %v1350_v23 = vmul.f32 %v1346_v33, %v1267_v28  ;;  %v1353_v43 = vadd.f32 %v1349_v57, %v2320_v0  ;;  %v1366_v0 = vshrl.u32 %v1365_v41, 7 }
 0xefe   :  { %v1348_v10 = vmul.f32 %v1344_v59, %v1265_v37  ;;  %v1351_v60 = vadd.f32 %v1347_v63, %v2311_v42 }
 0xeff   :  { %v1354_v32 = vadd.f32 %v1350_v23, %v2314_v36  ;;  %v1367_v34 = vsub.s32 0, %v1366_v0  ;;  %v1363_v36 = vpop.permute.xlu0 %1362 }
 0xf00   :  { %v1352_v58 = vadd.f32 %v1348_v10, %v2317_v2 }
 0xf01   :  { %v1358_v45 = vpack.c.bf16 %v1354_v32, %v1353_v43  ;;  %v1368_v42 = vrot.slane %v1363_v36, %v1367_v34 }
 0xf02   :  { %v1357_v40 = vpack.c.bf16 %v1352_v58, %v1351_v60 }
 0xf04   :  { %1669 = vmatpush3.bf16.msra.mxu0 %v1357_v40 }
 0xf05   :  { %1670 = vmatprep.subr.bf16.mxu0 %v1771_v19 }
 0xf08   :  { %1671 = vmatpush3.bf16.msra.mxu0 %v1358_v45 }
 0xf0b   :  { %1673 = vmatmul.mubr.msk.bf16.vlgmr.msra.gmra.mrb[32].mxu0 %vm117_vm0, %v1356_v22 }
 0xfde   :  { %v1406_v2 = vpop.f32.mrb[32].mxu0 }
 0xfdf   :  { %v1407_v1 = vadd.f32 %v1406_v2, %v1368_v42  ;;  %v1674_v44 = vpop.f32.mrb[33].mxu0 }
 0xfe0   :  { %v1409_v55 = vpop.f32.mrb[34].mxu0 }
 0xfe1   :  { %v1675_v20 = vpop.f32.mrb[35].mxu0  ;;  %1413 = vst.msk [vmem:[#allocation3] sm:$0x1] %vm1412_vm2, %v1407_v1 }
 0xfe2   :  { %1757 = shalt.err (!%p1754_p4)
}
 0xfe3   :  { %s1758_s15 = scalar_lea.hbm %s2374_s8, 16 }
 0xfe4   :  { %p1759_p5 = scmp.ne.s32.totalorder %s2374_s8, %s1758_s15  ;;  %p1762_p6 = scmp.lt.u32.totalorder %s1758_s15, %s2374_s8 }
 0xfe6   :  { %p1764_p7 = pnand %p1762_p6, %p1759_p5 }
 0xfe8   :  { %1767 = shalt.err (!%p1764_p7)
}
 0xfe9   :  { %1423 = dma.vmem_to_hbm [thread:$0]  %s1421_s12, 16, %s2374_s8, [#allocation4]  }
 0xfea   :  { %1768 = dma.done.wait [#allocation4], 16  }
 0xfeb   :  { %1769 = vsyncadd [#allocation4], 4294967280 }
 0xfec   :  { %1427 = vsyncpa [#allocation4], 1 }

</bundles_post_ra>
